<compile_context>
chip_gen: v7x
topology: tpu7x:2x2x1
jax: 0.10.0
libtpu: 0.0.40
codegen_flags: <defaults>
</compile_context>

<pallas_src>
import functools
import math

import jax
import jax.numpy as jnp
from jax import lax
from jax.experimental import pallas as pl
from jax.experimental.pallas import tpu as pltpu

INPUT_DIM = 7
HIDDEN_DIM = 64
N_LAYERS = 3


# --------------------------------------------------------------------------------------
# Kernel
# --------------------------------------------------------------------------------------

def dgm_kernel(x_ref, wx_ref, misc_ref, wzr_ref, wg_ref, wh_ref, o_ref):
    # x_ref:    (tile_b, D)   f32
    # wx_ref:   (D, NC)       bf16  packed columns: [zr blocks | g blocks | h blocks | W_in | pad]
    # misc_ref: (2, NC)       f32   row0 = packed biases (same layout), row1 = [b_out @ col0, w_out @ W_in slot]
    # wzr_ref:  (L, H, 2H)    bf16  packed [W_z | W_r] per layer
    # wg_ref:   (H, L*H)      bf16  all layers' W_g side by side
    # wh_ref:   (L, H, H)     bf16
    # o_ref:    (1, tile_b)   f32   lane-dense output row
    L = wzr_ref.shape[0]
    H = wzr_ref.shape[1]
    cdt = wx_ref.dtype                      # bf16 compute dtype for MXU operands

    off_g = 2 * L * H
    off_h = 3 * L * H
    off_in = 4 * L * H

    x = x_ref[...].astype(cdt)

    # One lane-dense matmul for every x-projection (input layer + all U gates of all
    # layers); all biases folded into a single broadcast add.
    ux = (jnp.dot(x, wx_ref[...], preferred_element_type=jnp.float32)
          + misc_ref[0:1, :])                                     # (tile_b, NC)

    # Input layer: s = tanh(x @ W_in + b_in).
    s = jnp.tanh(ux[:, off_in:off_in + H])                        # (tile_b, H)
    s_first = s

    # g-gates are loop-invariant (only depend on s_first): all layers in one matmul.
    G = jnp.tanh(ux[:, off_g:off_g + L * H]
                 + jnp.dot(s_first.astype(cdt), wg_ref[...],
                           preferred_element_type=jnp.float32))   # (tile_b, L*H)

    for l in range(L):                                            # static unroll (L small)
        # z and r share LHS (s): one (H, 2H) lane-dense matmul + one tanh.
        zr = jnp.tanh(ux[:, 2 * l * H:2 * (l + 1) * H]
                      + jnp.dot(s.astype(cdt), wzr_ref[l],
                                preferred_element_type=jnp.float32))
        z = zr[:, :H]
        r = zr[:, H:]
        g = G[:, l * H:(l + 1) * H]
        h = jnp.tanh(ux[:, off_h + l * H:off_h + (l + 1) * H]
                     + jnp.dot((s * r).astype(cdt), wh_ref[l],
                               preferred_element_type=jnp.float32))
        s = (1.0 - g) * h + z * s

    # Output layer, produced lane-dense: (1, H) contracted with s on H -> (1, tile_b).
    w_out = misc_ref[1:2, off_in:off_in + H]                      # (1, H)
    b_out = misc_ref[1:2, 0:1]                                    # (1, 1)
    out_row = lax.dot_general(w_out, s, (((1,), (1,)), ((), ())),
                              preferred_element_type=jnp.float32) + b_out
    o_ref[...] = out_row.astype(o_ref.dtype)


# --------------------------------------------------------------------------------------
# Wrapper
# --------------------------------------------------------------------------------------

def _choose_n_tiles(batch):
    """1 grid step on single-TensorCore chips (v5e/v6e); 2 parallel tiles on v7x."""
    try:
        kind = jax.devices()[0].device_kind.lower()
    except Exception:
        kind = ""
    two_tc = ("v7" in kind) or ("7x" in kind)
    return 2 if (two_tc and batch >= 256) else 1


@functools.partial(jax.jit, static_argnames=("n_tiles",))
def _dgm_net_pallas(x, packed, n_tiles):
    B, D = x.shape
    if n_tiles == 1:
        tile_b = B                               # single grid step, block == full array
    else:
        tile_b = ((pl.cdiv(B, n_tiles) + 127) // 128) * 128   # lane-aligned output tiles
    Bp = n_tiles * tile_b
    if Bp != B:
        x = jnp.pad(x, ((0, Bp - B), (0, 0)))

    wx, misc, wzr, wg, wh = (packed["Wx"], packed["misc"], packed["Wzr"],
                             packed["Wg"], packed["Wh"])

    out = pl.pallas_call(
        dgm_kernel,
        out_shape=jax.ShapeDtypeStruct((1, Bp), jnp.float32),
        grid=(n_tiles,),
        in_specs=[
            pl.BlockSpec((tile_b, D), lambda i: (i, 0)),      # x: tiled over batch
            pl.BlockSpec(wx.shape, lambda i: (0, 0)),         # packed x-projection weights
            pl.BlockSpec(misc.shape, lambda i: (0, 0)),       # biases + output layer slab
            pl.BlockSpec(wzr.shape, lambda i: (0, 0, 0)),     # [W_z | W_r]
            pl.BlockSpec(wg.shape, lambda i: (0, 0)),         # all W_g
            pl.BlockSpec(wh.shape, lambda i: (0, 0, 0)),      # W_h
        ],
        out_specs=pl.BlockSpec((1, tile_b), lambda i: (0, i)),
        compiler_params=pltpu.CompilerParams(
            dimension_semantics=("parallel",)),
    )(x, wx, misc, wzr, wg, wh)
    return out[0, :B][:, None]                                 # (B, 1)


def dgm_net_pallas(x, packed):
    return _dgm_net_pallas(x, packed, _choose_n_tiles(x.shape[0]))


# --------------------------------------------------------------------------------------
# Parameter construction (matches the PyTorch module's init) + packing for the kernel.
# --------------------------------------------------------------------------------------

def xavier_uniform(key, fan_in, fan_out, shape):
    bound = math.sqrt(6.0 / (fan_in + fan_out))
    return jax.random.uniform(key, shape, jnp.float32, minval=-bound, maxval=bound)


def init_params(key, input_dim=INPUT_DIM, hidden_dim=HIDDEN_DIM, n_layers=N_LAYERS):
    keys = jax.random.split(key, 2 + n_layers * 8)
    ki = iter(range(len(keys)))

    # Input layer: torch weight (H, D) -> stored transposed (D, H); bias (1, H).
    win = xavier_uniform(keys[next(ki)], input_dim, hidden_dim, (input_dim, hidden_dim))
    bin_ = jnp.zeros((1, hidden_dim), jnp.float32)

    # Per DGM block, gate index 0..3 = z, g, r, h (as in the PyTorch module).
    Uw, Ub, Ww = [], [], []
    for _ in range(n_layers):
        u_list, ub_list, w_list = [], [], []
        for _g in range(4):
            u_list.append(
                xavier_uniform(keys[next(ki)], input_dim, hidden_dim,
                               (input_dim, hidden_dim)))
            ub_list.append(jnp.zeros((1, hidden_dim), jnp.float32))
            w_list.append(
                xavier_uniform(keys[next(ki)], hidden_dim, hidden_dim,
                               (hidden_dim, hidden_dim)))
        Uw.append(jnp.stack(u_list))
        Ub.append(jnp.stack(ub_list))
        Ww.append(jnp.stack(w_list))

    wout = xavier_uniform(keys[next(ki)], hidden_dim, 1, (hidden_dim, 1))
    bout = jnp.zeros((1, 1), jnp.float32)

    return {
        "win": win, "bin": bin_,
        "Uw": jnp.stack(Uw), "Ub": jnp.stack(Ub), "Ww": jnp.stack(Ww),
        "wout": wout, "bout": bout,
    }


def pack_params(params, mxu_dtype=jnp.bfloat16):
    """Repack canonical params into the lane-packed layout the kernel expects."""
    Uw, Ub, Ww = params["Uw"], params["Ub"], params["Ww"]   # (L,4,D,H), (L,4,1,H), (L,4,H,H)
    L, _, D, H = Uw.shape
    GATE_Z, GATE_G, GATE_R, GATE_H = 0, 1, 2, 3             # module gate order

    # Column layout of the packed x-projection matrix (and its bias row):
    #   [z0 r0 | z1 r1 | ...]   zr blocks (2H each, 128-lane aligned for H=64)
    #   [g0 g1 ...]             g blocks, contiguous L*H
    #   [h0 h1 ...]             h blocks
    #   [W_in]                  input layer
    #   [zero pad to a multiple of 128 lanes]
    cols, bias_cols = [], []
    for l in range(L):
        cols += [Uw[l, GATE_Z], Uw[l, GATE_R]]
        bias_cols += [Ub[l, GATE_Z], Ub[l, GATE_R]]
    for l in range(L):
        cols.append(Uw[l, GATE_G]); bias_cols.append(Ub[l, GATE_G])
    for l in range(L):
        cols.append(Uw[l, GATE_H]); bias_cols.append(Ub[l, GATE_H])
    cols.append(params["win"]); bias_cols.append(params["bin"])

    Wx = jnp.concatenate(cols, axis=1)        # (D, (4L+1)*H)
    bx = jnp.concatenate(bias_cols, axis=1)   # (1, (4L+1)*H)

    total = Wx.shape[1]
    NC = ((total + 127) // 128) * 128
    if NC != total:
        Wx = jnp.pad(Wx, ((0, 0), (0, NC - total)))
        bx = jnp.pad(bx, ((0, 0), (0, NC - total)))

    # misc slab: row 0 = packed biases, row 1 = [b_out at col 0, w_out at the W_in slot].
    off_in = 4 * L * H
    wrow = jnp.zeros((1, NC), jnp.float32)
    wrow = wrow.at[0, off_in:off_in + H].set(params["wout"][:, 0])
    wrow = wrow.at[0, 0].set(params["bout"][0, 0])
    misc = jnp.concatenate([bx.astype(jnp.float32), wrow], axis=0)   # (2, NC)

    Wzr = jnp.concatenate([Ww[:, GATE_Z], Ww[:, GATE_R]], axis=-1)   # (L, H, 2H)
    Wg = jnp.concatenate([Ww[l, GATE_G] for l in range(L)], axis=1)  # (H, L*H)
    Wh = Ww[:, GATE_H]                                               # (L, H, H)

    return {
        "Wx": Wx.astype(mxu_dtype),
        "misc": misc,
        "Wzr": Wzr.astype(mxu_dtype),
        "Wg": Wg.astype(mxu_dtype),
        "Wh": Wh.astype(mxu_dtype),
    }


def dgm_net_reference(x, params):
    """Pure-JAX f32 reference matching the PyTorch forward pass (unpacked weights)."""
    s = jnp.tanh(x @ params["win"] + params["bin"])
    s_first = s
    for l in range(params["Uw"].shape[0]):
        Uw, Ub, Ww = params["Uw"][l], params["Ub"][l], params["Ww"][l]
        z = jnp.tanh(x @ Uw[0] + Ub[0] + s @ Ww[0])
        g = jnp.tanh(x @ Uw[1] + Ub[1] + s_first @ Ww[1])
        r = jnp.tanh(x @ Uw[2] + Ub[2] + s @ Ww[2])
        h = jnp.tanh(x @ Uw[3] + Ub[3] + (s * r) @ Ww[3])
        s = (1.0 - g) * h + z * s
    return s @ params["wout"] + params["bout"]


if __name__ == "__main__":
    key = jax.random.PRNGKey(0)
    k_param, k_x = jax.random.split(key)

    BATCH = 64   # small example batch; kernel handles arbitrary batch sizes
    params = init_params(k_param, INPUT_DIM, HIDDEN_DIM, N_LAYERS)
    packed = pack_params(params)
    x = jax.random.normal(k_x, (BATCH, INPUT_DIM), jnp.float32)

    out = jax.block_until_ready(dgm_net_pallas(x, packed))

    ref = dgm_net_reference(x, params)
    assert out.shape == (BATCH, 1)
    # bf16 MXU operands with f32 accumulation -> loosened tolerance vs the f32 reference.
    max_err = float(jnp.max(jnp.abs(out - ref)))
    assert jnp.allclose(out, ref, atol=3e-2, rtol=3e-2), f"mismatch vs reference: {max_err}"

    print("KERNEL_OK")
</pallas_src>

<mosaic_0001>
module attributes {stable_mosaic.version = 11 : i64} {
  func.func @dgm_kernel(%arg0: i32, %arg1: memref<64x7xf32, #tpu.memory_space<vmem>>, %arg2: memref<7x896xbf16, #tpu.memory_space<vmem>>, %arg3: memref<2x896xf32, #tpu.memory_space<vmem>>, %arg4: memref<3x64x128xbf16, #tpu.memory_space<vmem>>, %arg5: memref<64x192xbf16, #tpu.memory_space<vmem>>, %arg6: memref<3x64x64xbf16, #tpu.memory_space<vmem>>, %arg7: memref<1x64xf32, #tpu.memory_space<vmem>>) attributes {dimension_semantics = [#tpu.dimension_semantics<parallel>], iteration_bounds = array<i64: 1>, scalar_prefetch = 0 : i64, scratch_operands = 0 : i64, tpu.core_type = #tpu.core_type<tc>, window_params = [{transform_indices = @transform_0, window_bounds = array<i64: 64, 7>}, {pipeline_mode = #tpu.pipeline_mode<synchronous>, transform_indices = @transform_1, window_bounds = array<i64: 7, 896>}, {pipeline_mode = #tpu.pipeline_mode<synchronous>, transform_indices = @transform_2, window_bounds = array<i64: 2, 896>}, {pipeline_mode = #tpu.pipeline_mode<synchronous>, transform_indices = @transform_3, window_bounds = array<i64: 3, 64, 128>}, {pipeline_mode = #tpu.pipeline_mode<synchronous>, transform_indices = @transform_4, window_bounds = array<i64: 64, 192>}, {pipeline_mode = #tpu.pipeline_mode<synchronous>, transform_indices = @transform_5, window_bounds = array<i64: 3, 64, 64>}, {transform_indices = @transform_6, window_bounds = array<i64: 1, 64>}]} {
    %c0 = arith.constant 0 : index
    %c0_0 = arith.constant 0 : index
    %0 = vector.load %arg1[%c0, %c0_0] : memref<64x7xf32, #tpu.memory_space<vmem>>, vector<64x7xf32>
    %1 = arith.truncf %0 : vector<64x7xf32> to vector<64x7xbf16>
    %c0_1 = arith.constant 0 : index
    %c0_2 = arith.constant 0 : index
    %2 = vector.load %arg2[%c0_1, %c0_2] : memref<7x896xbf16, #tpu.memory_space<vmem>>, vector<7x896xbf16>
    %cst = arith.constant dense<0.000000e+00> : vector<64x896xf32>
    %3 = tpu.matmul %1, %2, %cst {dimension_numbers = #tpu.dot_dimension_numbers<[1], [0], [0], [1], [0, 0, 1, 1], [], []>} : vector<64x7xbf16>, vector<7x896xbf16>, vector<64x896xf32> -> vector<64x896xf32>
    %c0_3 = arith.constant 0 : index
    %c0_4 = arith.constant 0 : index
    %4 = vector.load %arg3[%c0_3, %c0_4] : memref<2x896xf32, #tpu.memory_space<vmem>>, vector<1x896xf32>
    %5 = vector.broadcast %4 : vector<1x896xf32> to vector<64x896xf32>
    %6 = arith.addf %3, %5 : vector<64x896xf32>
    %7 = vector.extract_strided_slice %6 {offsets = [0, 768], sizes = [64, 64], strides = [1, 1]} : vector<64x896xf32> to vector<64x64xf32>
    %8 = math.tanh %7 : vector<64x64xf32>
    %9 = vector.extract_strided_slice %6 {offsets = [0, 384], sizes = [64, 192], strides = [1, 1]} : vector<64x896xf32> to vector<64x192xf32>
    %10 = arith.truncf %8 : vector<64x64xf32> to vector<64x64xbf16>
    %c0_5 = arith.constant 0 : index
    %c0_6 = arith.constant 0 : index
    %11 = vector.load %arg5[%c0_5, %c0_6] : memref<64x192xbf16, #tpu.memory_space<vmem>>, vector<64x192xbf16>
    %cst_7 = arith.constant dense<0.000000e+00> : vector<64x192xf32>
    %12 = tpu.matmul %10, %11, %cst_7 {dimension_numbers = #tpu.dot_dimension_numbers<[1], [0], [0], [1], [0, 0, 1, 1], [], []>} : vector<64x64xbf16>, vector<64x192xbf16>, vector<64x192xf32> -> vector<64x192xf32>
    %13 = arith.addf %9, %12 : vector<64x192xf32>
    %14 = math.tanh %13 : vector<64x192xf32>
    %15 = vector.extract_strided_slice %6 {offsets = [0, 0], sizes = [64, 128], strides = [1, 1]} : vector<64x896xf32> to vector<64x128xf32>
    %16 = arith.truncf %8 : vector<64x64xf32> to vector<64x64xbf16>
    %c0_8 = arith.constant 0 : index
    %c0_9 = arith.constant 0 : index
    %c0_10 = arith.constant 0 : index
    %17 = vector.load %arg4[%c0_8, %c0_9, %c0_10] : memref<3x64x128xbf16, #tpu.memory_space<vmem>>, vector<1x64x128xbf16>
    %18 = vector.shape_cast %17 : vector<1x64x128xbf16> to vector<64x128xbf16>
    %cst_11 = arith.constant dense<0.000000e+00> : vector<64x128xf32>
    %19 = tpu.matmul %16, %18, %cst_11 {dimension_numbers = #tpu.dot_dimension_numbers<[1], [0], [0], [1], [0, 0, 1, 1], [], []>} : vector<64x64xbf16>, vector<64x128xbf16>, vector<64x128xf32> -> vector<64x128xf32>
    %20 = arith.addf %15, %19 : vector<64x128xf32>
    %21 = math.tanh %20 : vector<64x128xf32>
    %22 = vector.extract_strided_slice %21 {offsets = [0, 0], sizes = [64, 64], strides = [1, 1]} : vector<64x128xf32> to vector<64x64xf32>
    %23 = vector.extract_strided_slice %21 {offsets = [0, 64], sizes = [64, 64], strides = [1, 1]} : vector<64x128xf32> to vector<64x64xf32>
    %24 = vector.extract_strided_slice %14 {offsets = [0, 0], sizes = [64, 64], strides = [1, 1]} : vector<64x192xf32> to vector<64x64xf32>
    %25 = vector.extract_strided_slice %6 {offsets = [0, 576], sizes = [64, 64], strides = [1, 1]} : vector<64x896xf32> to vector<64x64xf32>
    %26 = arith.mulf %8, %23 : vector<64x64xf32>
    %27 = arith.truncf %26 : vector<64x64xf32> to vector<64x64xbf16>
    %c0_12 = arith.constant 0 : index
    %c0_13 = arith.constant 0 : index
    %c0_14 = arith.constant 0 : index
    %28 = vector.load %arg6[%c0_12, %c0_13, %c0_14] : memref<3x64x64xbf16, #tpu.memory_space<vmem>>, vector<1x64x64xbf16>
    %29 = vector.shape_cast %28 : vector<1x64x64xbf16> to vector<64x64xbf16>
    %cst_15 = arith.constant dense<0.000000e+00> : vector<64x64xf32>
    %30 = tpu.matmul %27, %29, %cst_15 {dimension_numbers = #tpu.dot_dimension_numbers<[1], [0], [0], [1], [0, 0, 1, 1], [], []>} : vector<64x64xbf16>, vector<64x64xbf16>, vector<64x64xf32> -> vector<64x64xf32>
    %31 = arith.addf %25, %30 : vector<64x64xf32>
    %32 = math.tanh %31 : vector<64x64xf32>
    %cst_16 = arith.constant 1.000000e+00 : f32
    %33 = vector.broadcast %cst_16 : f32 to vector<64x64xf32>
    %34 = arith.subf %33, %24 : vector<64x64xf32>
    %35 = arith.mulf %34, %32 : vector<64x64xf32>
    %36 = arith.mulf %22, %8 : vector<64x64xf32>
    %37 = arith.addf %35, %36 : vector<64x64xf32>
    %38 = vector.extract_strided_slice %6 {offsets = [0, 128], sizes = [64, 128], strides = [1, 1]} : vector<64x896xf32> to vector<64x128xf32>
    %39 = arith.truncf %37 : vector<64x64xf32> to vector<64x64xbf16>
    %c1 = arith.constant 1 : index
    %c0_17 = arith.constant 0 : index
    %c0_18 = arith.constant 0 : index
    %40 = vector.load %arg4[%c1, %c0_17, %c0_18] : memref<3x64x128xbf16, #tpu.memory_space<vmem>>, vector<1x64x128xbf16>
    %41 = vector.shape_cast %40 : vector<1x64x128xbf16> to vector<64x128xbf16>
    %cst_19 = arith.constant dense<0.000000e+00> : vector<64x128xf32>
    %42 = tpu.matmul %39, %41, %cst_19 {dimension_numbers = #tpu.dot_dimension_numbers<[1], [0], [0], [1], [0, 0, 1, 1], [], []>} : vector<64x64xbf16>, vector<64x128xbf16>, vector<64x128xf32> -> vector<64x128xf32>
    %43 = arith.addf %38, %42 : vector<64x128xf32>
    %44 = math.tanh %43 : vector<64x128xf32>
    %45 = vector.extract_strided_slice %44 {offsets = [0, 0], sizes = [64, 64], strides = [1, 1]} : vector<64x128xf32> to vector<64x64xf32>
    %46 = vector.extract_strided_slice %44 {offsets = [0, 64], sizes = [64, 64], strides = [1, 1]} : vector<64x128xf32> to vector<64x64xf32>
    %47 = vector.extract_strided_slice %14 {offsets = [0, 64], sizes = [64, 64], strides = [1, 1]} : vector<64x192xf32> to vector<64x64xf32>
    %48 = vector.extract_strided_slice %6 {offsets = [0, 640], sizes = [64, 64], strides = [1, 1]} : vector<64x896xf32> to vector<64x64xf32>
    %49 = arith.mulf %37, %46 : vector<64x64xf32>
    %50 = arith.truncf %49 : vector<64x64xf32> to vector<64x64xbf16>
    %c1_20 = arith.constant 1 : index
    %c0_21 = arith.constant 0 : index
    %c0_22 = arith.constant 0 : index
    %51 = vector.load %arg6[%c1_20, %c0_21, %c0_22] : memref<3x64x64xbf16, #tpu.memory_space<vmem>>, vector<1x64x64xbf16>
    %52 = vector.shape_cast %51 : vector<1x64x64xbf16> to vector<64x64xbf16>
    %cst_23 = arith.constant dense<0.000000e+00> : vector<64x64xf32>
    %53 = tpu.matmul %50, %52, %cst_23 {dimension_numbers = #tpu.dot_dimension_numbers<[1], [0], [0], [1], [0, 0, 1, 1], [], []>} : vector<64x64xbf16>, vector<64x64xbf16>, vector<64x64xf32> -> vector<64x64xf32>
    %54 = arith.addf %48, %53 : vector<64x64xf32>
    %55 = math.tanh %54 : vector<64x64xf32>
    %cst_24 = arith.constant 1.000000e+00 : f32
    %56 = vector.broadcast %cst_24 : f32 to vector<64x64xf32>
    %57 = arith.subf %56, %47 : vector<64x64xf32>
    %58 = arith.mulf %57, %55 : vector<64x64xf32>
    %59 = arith.mulf %45, %37 : vector<64x64xf32>
    %60 = arith.addf %58, %59 : vector<64x64xf32>
    %61 = vector.extract_strided_slice %6 {offsets = [0, 256], sizes = [64, 128], strides = [1, 1]} : vector<64x896xf32> to vector<64x128xf32>
    %62 = arith.truncf %60 : vector<64x64xf32> to vector<64x64xbf16>
    %c2 = arith.constant 2 : index
    %c0_25 = arith.constant 0 : index
    %c0_26 = arith.constant 0 : index
    %63 = vector.load %arg4[%c2, %c0_25, %c0_26] : memref<3x64x128xbf16, #tpu.memory_space<vmem>>, vector<1x64x128xbf16>
    %64 = vector.shape_cast %63 : vector<1x64x128xbf16> to vector<64x128xbf16>
    %cst_27 = arith.constant dense<0.000000e+00> : vector<64x128xf32>
    %65 = tpu.matmul %62, %64, %cst_27 {dimension_numbers = #tpu.dot_dimension_numbers<[1], [0], [0], [1], [0, 0, 1, 1], [], []>} : vector<64x64xbf16>, vector<64x128xbf16>, vector<64x128xf32> -> vector<64x128xf32>
    %66 = arith.addf %61, %65 : vector<64x128xf32>
    %67 = math.tanh %66 : vector<64x128xf32>
    %68 = vector.extract_strided_slice %67 {offsets = [0, 0], sizes = [64, 64], strides = [1, 1]} : vector<64x128xf32> to vector<64x64xf32>
    %69 = vector.extract_strided_slice %67 {offsets = [0, 64], sizes = [64, 64], strides = [1, 1]} : vector<64x128xf32> to vector<64x64xf32>
    %70 = vector.extract_strided_slice %14 {offsets = [0, 128], sizes = [64, 64], strides = [1, 1]} : vector<64x192xf32> to vector<64x64xf32>
    %71 = vector.extract_strided_slice %6 {offsets = [0, 704], sizes = [64, 64], strides = [1, 1]} : vector<64x896xf32> to vector<64x64xf32>
    %72 = arith.mulf %60, %69 : vector<64x64xf32>
    %73 = arith.truncf %72 : vector<64x64xf32> to vector<64x64xbf16>
    %c2_28 = arith.constant 2 : index
    %c0_29 = arith.constant 0 : index
    %c0_30 = arith.constant 0 : index
    %74 = vector.load %arg6[%c2_28, %c0_29, %c0_30] : memref<3x64x64xbf16, #tpu.memory_space<vmem>>, vector<1x64x64xbf16>
    %75 = vector.shape_cast %74 : vector<1x64x64xbf16> to vector<64x64xbf16>
    %cst_31 = arith.constant dense<0.000000e+00> : vector<64x64xf32>
    %76 = tpu.matmul %73, %75, %cst_31 {dimension_numbers = #tpu.dot_dimension_numbers<[1], [0], [0], [1], [0, 0, 1, 1], [], []>} : vector<64x64xbf16>, vector<64x64xbf16>, vector<64x64xf32> -> vector<64x64xf32>
    %77 = arith.addf %71, %76 : vector<64x64xf32>
    %78 = math.tanh %77 : vector<64x64xf32>
    %cst_32 = arith.constant 1.000000e+00 : f32
    %79 = vector.broadcast %cst_32 : f32 to vector<64x64xf32>
    %80 = arith.subf %79, %70 : vector<64x64xf32>
    %81 = arith.mulf %80, %78 : vector<64x64xf32>
    %82 = arith.mulf %68, %60 : vector<64x64xf32>
    %83 = arith.addf %81, %82 : vector<64x64xf32>
    %c1_33 = arith.constant 1 : index
    %c768 = arith.constant 768 : index
    %84 = vector.load %arg3[%c1_33, %c768] : memref<2x896xf32, #tpu.memory_space<vmem>>, vector<1x64xf32>
    %c1_34 = arith.constant 1 : index
    %c0_35 = arith.constant 0 : index
    %85 = vector.load %arg3[%c1_34, %c0_35] : memref<2x896xf32, #tpu.memory_space<vmem>>, vector<1x1xf32>
    %cst_36 = arith.constant dense<0.000000e+00> : vector<1x64xf32>
    %86 = tpu.matmul %84, %83, %cst_36 {dimension_numbers = #tpu.dot_dimension_numbers<[1], [1], [0], [0], [0, 0, 1, 0], [], []>} : vector<1x64xf32>, vector<64x64xf32>, vector<1x64xf32> -> vector<1x64xf32>
    %87 = vector.broadcast %85 : vector<1x1xf32> to vector<1x64xf32>
    %88 = arith.addf %86, %87 : vector<1x64xf32>
    %c0_37 = arith.constant 0 : index
    %c0_38 = arith.constant 0 : index
    %89 = vector.load %arg7[%c0_37, %c0_38] : memref<1x64xf32, #tpu.memory_space<vmem>>, vector<1x64xf32>
    tpu.vector_store %arg7[%c0_37, %c0_38], %88 {strides = array<i32>} : memref<1x64xf32, #tpu.memory_space<vmem>>, vector<1x64xf32>,
    return
  }
  func.func @transform_0(%arg0: i32) -> (i32, i32) {
    %c0_i32 = arith.constant 0 : i32
    %c0_i32_0 = arith.constant 0 : i32
    return %arg0, %c0_i32 : i32, i32
  }
  func.func @transform_1(%arg0: i32) -> (i32, i32) {
    %c0_i32 = arith.constant 0 : i32
    %c0_i32_0 = arith.constant 0 : i32
    %c0_i32_1 = arith.constant 0 : i32
    return %c0_i32, %c0_i32_0 : i32, i32
  }
  func.func @transform_2(%arg0: i32) -> (i32, i32) {
    %c0_i32 = arith.constant 0 : i32
    %c0_i32_0 = arith.constant 0 : i32
    %c0_i32_1 = arith.constant 0 : i32
    return %c0_i32, %c0_i32_0 : i32, i32
  }
  func.func @transform_3(%arg0: i32) -> (i32, i32, i32) {
    %c0_i32 = arith.constant 0 : i32
    %c0_i32_0 = arith.constant 0 : i32
    %c0_i32_1 = arith.constant 0 : i32
    %c0_i32_2 = arith.constant 0 : i32
    return %c0_i32, %c0_i32_0, %c0_i32_1 : i32, i32, i32
  }
  func.func @transform_4(%arg0: i32) -> (i32, i32) {
    %c0_i32 = arith.constant 0 : i32
    %c0_i32_0 = arith.constant 0 : i32
    %c0_i32_1 = arith.constant 0 : i32
    return %c0_i32, %c0_i32_0 : i32, i32
  }
  func.func @transform_5(%arg0: i32) -> (i32, i32, i32) {
    %c0_i32 = arith.constant 0 : i32
    %c0_i32_0 = arith.constant 0 : i32
    %c0_i32_1 = arith.constant 0 : i32
    %c0_i32_2 = arith.constant 0 : i32
    return %c0_i32, %c0_i32_0, %c0_i32_1 : i32, i32, i32
  }
  func.func @transform_6(%arg0: i32) -> (i32, i32) {
    %c0_i32 = arith.constant 0 : i32
    %c0_i32_0 = arith.constant 0 : i32
    return %c0_i32, %arg0 : i32, i32
  }
}

</mosaic_0001>

<bundles_post_ra>
// kernel: _dgm_net_pallas.1
= control target key start
LH: loop header
LB: loop body
LE: loop exit
PB: predicated region body
PF: predicated region fallthrough
CT: control target
= control target key end

     0   :  { %11 = vsyncpa [#allocation3], 0  ;;  %s3409_s0 = inlined_call_operand.vmem [shape: f32[64,7], index: 0, kind: input, shape index: {}]   ;;  %s3410_s1 = inlined_call_operand.hbm [shape: bf16[7,896], index: 1, kind: input, shape index: {}]   ;;  %s3411_s2 = inlined_call_operand.vmem [shape: f32[2,896], index: 2, kind: input, shape index: {}]   ;;  %s3412_s3 = inlined_call_operand.hbm [shape: bf16[3,64,128], index: 3, kind: input, shape index: {}]   ;;  %s3413_s4 = inlined_call_operand.vmem [shape: bf16[64,192], index: 4, kind: input, shape index: {}]   ;;  %s3414_s5 = inlined_call_operand.hbm [shape: bf16[3,64,64], index: 5, kind: input, shape index: {}]   ;;  %s3415_s6 = inlined_call_operand.hbm [shape: f32[1,64], index: 6, kind: output, shape index: {}]  }
   0x1   :  { %12 = vsyncpa [#allocation6], 0 }
   0x2   :  { %13 = vsyncpa [#allocation4], 0  ;;  %s2540_s21 = smov [#allocation5]   ;;  %s2446_s25 = scalar_lea.hbm %s3412_s3, 1536 }
   0x3   :  { %s33_s22 = sshll.u32 %s2540_s21, 4  ;;  %p2447_p0 = scmp.ne.s32.totalorder %s3412_s3, %s2446_s25  ;;  %s34_s22 = int_to_ptr.vmem [resolvable:$true] %s33_s22 }
   0x4   :  { %p2450_p1 = scmp.lt.u32.totalorder %s2446_s25, %s3412_s3 }
   0x6   :  { %p2452_p2 = pnand %p2450_p1, %p2447_p0 }
   0x8   :  { %2455 = shalt.err (!%p2452_p2)
}
   0x9   :  { %s2456_s30 = scalar_lea.vmem %s34_s22, 1536  ;;  %p2461_p4 = scmp.lt.s32.totalorder %s34_s22, %s34_s22 }
   0xa   :  { %p2457_p3 = scmp.ne.s32.totalorder %s34_s22, %s2456_s30  ;;  %p2462_p5 = scmp.lt.s32.totalorder %s2456_s30, %s2456_s30 }
   0xc   :  { %p2463_p6 = por %p2462_p5, %p2461_p4 }
   0xe   :  { %p2464_p7 = pnand %p2463_p6, %p2457_p3 }
  0x10   :  { %2467 = shalt.err (!%p2464_p7)
}
  0x11   :  { %s2541_s7 = smov 64   ;;  %s2542_s8 = smov 4  }
  0x12   :  { %39 = dma.hbm_to_vmem [thread:$0]  %s3412_s3, 1536, %s34_s22, [#allocation6], %s2541_s7, %s2541_s7, %s2542_s8  }
  0x13   :  { %s2543_s11 = smov [#allocation2]   ;;  %s2544_s13 = smov [#allocation7]  }
  0x14   :  { %s22_s12 = sshll.u32 %s2543_s11, 4  ;;  %s47_s14 = sshll.u32 %s2544_s13, 4  ;;  %s23_s12 = int_to_ptr.vmem [resolvable:$true] %s22_s12  ;;  %s48_s14 = int_to_ptr.vmem [resolvable:$true] %s47_s14 }
  0x15   :  { %s2468_s17 = scalar_lea.hbm %s3410_s1, 448 }
  0x16   :  { %p2469_p8 = scmp.ne.s32.totalorder %s3410_s1, %s2468_s17  ;;  %p2472_p9 = scmp.lt.u32.totalorder %s2468_s17, %s3410_s1 }
  0x18   :  { %p2474_p10 = pnand %p2472_p9, %p2469_p8 }
  0x1a   :  { %2477 = shalt.err (!%p2474_p10)
}
  0x1b   :  { %s2478_s3 = scalar_lea.vmem %s23_s12, 448  ;;  %p2483_p12 = scmp.lt.s32.totalorder %s23_s12, %s23_s12 }
  0x1c   :  { %p2479_p11 = scmp.ne.s32.totalorder %s23_s12, %s2478_s3  ;;  %p2484_p13 = scmp.lt.s32.totalorder %s2478_s3, %s2478_s3 }
  0x1e   :  { %p2485_p0 = por %p2484_p13, %p2483_p12 }
  0x20   :  { %p2486_p1 = pnand %p2485_p0, %p2479_p11 }
  0x22   :  { %2489 = shalt.err (!%p2486_p1)
}
  0x23   :  { %25 = dma.hbm_to_vmem [thread:$0]  %s3410_s1, 448, %s23_s12, [#allocation3]  }
  0x24   :  { %s2490_s26 = scalar_lea.hbm %s3414_s5, 1536 }
  0x25   :  { %p2491_p2 = scmp.ne.s32.totalorder %s3414_s5, %s2490_s26  ;;  %p2494_p3 = scmp.lt.u32.totalorder %s2490_s26, %s3414_s5 }
  0x27   :  { %p2496_p4 = pnand %p2494_p3, %p2491_p2 }
  0x29   :  { %2499 = shalt.err (!%p2496_p4)
}
  0x2a   :  { %s2500_s9 = scalar_lea.vmem %s48_s14, 1536  ;;  %p2505_p6 = scmp.lt.s32.totalorder %s48_s14, %s48_s14 }
  0x2b   :  { %p2501_p5 = scmp.ne.s32.totalorder %s48_s14, %s2500_s9  ;;  %p2506_p7 = scmp.lt.s32.totalorder %s2500_s9, %s2500_s9 }
  0x2d   :  { %p2507_p8 = por %p2506_p7, %p2505_p6 }
  0x2f   :  { %p2508_p9 = pnand %p2507_p8, %p2501_p5 }
  0x31   :  { %2511 = shalt.err (!%p2508_p9)
}
  0x32   :  { %53 = dma.hbm_to_vmem [thread:$0]  %s3414_s5, 1536, %s48_s14, [#allocation6], %s2541_s7, %s2541_s7, %s2542_s8  }
  0x33   :  { %2534 = dma.done.wait [#allocation3], 448  }
  0x34   :  { %2535 = vsyncadd [#allocation3], 4294966848 }
  0x35   :  { %2536 = dma.done.wait [#allocation6], 3072  }
  0x36   :  { %2537 = vsyncadd [#allocation6], 4294964224  ;;  %vm148_vm0 = vcmask 1042432   ;;  %v2545_v0 = vmov 0   ;;  %vm149_vm1 = vcmask 1043456   ;;  %v2546_v1 = vmov 65535  }
  0x37   :  { %278 = vmatprep.mubr.bf16.mxu1 %v2545_v0  ;;  %205 = vmatprep.mubr.bf16.mxu0 %v2545_v0  ;;  %v150_v2 = vsel %vm148_vm0, 4294967295, %v2546_v1  ;;  %v77_v3 = vld [vmem:[#allocation2 + $0x8] sm:$0xff]  ;;  %v2260_v7 = vld [vmem:[#allocation2 + $0x18] ss:$0 sps:$4 sm:$0xff]   ;;  %v64_v8 = vld [vmem:[%s3409_s0] sm:$0xff]  ;;  %vm135_vm2 = vcmask 56320  }
  0x38   :  { %2257 = vset.pattern.permute.xlu0 %v2545_v0  ;;  %v151_v4 = vsel %vm149_vm1, %v150_v2, 0  ;;  %v1953_v5 = vcombine.high %v77_v3, %v77_v3  ;;  %v1952_v6 = vcombine.low %v77_v3, %v77_v3  ;;  %v65_v9 = vld [vmem:[%s3409_s0 + $0x8] sm:$0xff]  ;;  %v76_v13 = vld [vmem:[#allocation2] sm:$0xff]  ;;  %v78_v16 = vld [vmem:[#allocation2 + $0x10] sm:$0xff]  ;;  %v82_v3 = vlaneseq  ;;  %s2551_s20 = smov [#allocation8]  }
  0x39   :  { %v171_v12 = vand.u32 %v2260_v7, %v151_v4  ;;  %v1951_v14 = vcombine.high %v76_v13, %v76_v13  ;;  %v1950_v15 = vcombine.low %v76_v13, %v76_v13  ;;  %v72_v17 = vpack.c.bf16 %v65_v9, %v64_v8  ;;  %v66_v23 = vld [vmem:[%s3409_s0 + $0x10] sm:$0xff]  ;;  %v67_v24 = vld [vmem:[%s3409_s0 + $0x18] sm:$0xff]  ;;  %v68_v27 = vld [vmem:[%s3409_s0 + $0x20] sm:$0xff]  ;;  %s1940_s21 = sshll.u32 %s2551_s20, 4  ;;  %s1941_s21 = int_to_ptr.vmem [resolvable:$true] %s1940_s21 }
  0x3a   :  { %v162_v10 = vand.u32 %v1953_v5, %v151_v4  ;;  %v159_v11 = vand.u32 %v1952_v6, %v151_v4  ;;  %v1954_v18 = vcombine.low %v78_v16, %v78_v16  ;;  %v1955_v19 = vcombine.high %v78_v16, %v78_v16  ;;  %v69_v28 = vld [vmem:[%s3409_s0 + $0x28] sm:$0xff]  ;;  %v70_v30 = vld [vmem:[%s3409_s0 + $0x30] sm:$0xff]  ;;  %v71_v31 = vld [vmem:[%s3409_s0 + $0x38] sm:$0xff]  ;;  %s2512_s3 = scalar_lea.vmem %s1941_s21, 16  ;;  %p2517_p11 = scmp.lt.s32.totalorder %s1941_s21, %s1941_s21 }
  0x3b   :  { %v156_v20 = vand.u32 %v1951_v14, %v151_v4  ;;  %v153_v21 = vand.u32 %v1950_v15, %v151_v4  ;;  %v73_v26 = vpack.c.bf16 %v67_v24, %v66_v23  ;;  %v74_v29 = vpack.c.bf16 %v69_v28, %v68_v27  ;;  %v2265_v33 = vld [vmem:[#allocation5] sm:$0xff]   ;;  %v2266_v34 = vld [vmem:[#allocation5 + $0x8] sm:$0xff]   ;;  %v2267_v36 = vld [vmem:[%s3413_s4] ss:$8 sps:$4 sm:$0xff]   ;;  %p2513_p10 = scmp.ne.s32.totalorder %s1941_s21, %s2512_s3 }
  0x3c   :  { %246 = vmatprep.subr.bf16.mxu1 %v162_v10  ;;  %v168_v22 = vand.u32 %v1955_v19, %v151_v4  ;;  %v165_v25 = vand.u32 %v1954_v18, %v151_v4  ;;  %v75_v32 = vpack.c.bf16 %v71_v31, %v70_v30  ;;  %v2269_v35 = vld [vmem:[%s3413_s4 + $0x4] ss:$8 sps:$4 sm:$0xff]   ;;  %v2273_v37 = vld [vmem:[%s3413_s4 + $0x14] ss:$8 sps:$4 sm:$0xff]   ;;  %v2271_v39 = vld [vmem:[%s3413_s4 + $0x10] ss:$8 sps:$4 sm:$0xff]  }
  0x3d   :  { %247 = vmatpush1.bf16.msra.mxu1 %v159_v11  ;;  %173 = vmatprep.subr.bf16.mxu0 %v156_v20  ;;  %v2270_v38 = vld [vmem:[#allocation5 + $0x10] sm:$0xff]   ;;  %v2276_v40 = vld [vmem:[%s3413_s4 + $0x24] ss:$8 sps:$4 sm:$0xff]   ;;  %v2278_v44 = vld [vmem:[%s3413_s4 + $0x30] ss:$8 sps:$4 sm:$0xff]   ;;  %v2755_v7 = vshrl.u32 %v82_v3, 7 }
  0x3e   :  { %2104 = vmatprep.subr.bf16.mxu1 %v171_v12  ;;  %174 = vmatpush1.bf16.msra.mxu0 %v153_v21  ;;  %v2274_v41 = vld [vmem:[%s3413_s4 + $0x20] ss:$8 sps:$4 sm:$0xff]   ;;  %v2280_v42 = vld [vmem:[%s3413_s4 + $0x34] ss:$8 sps:$4 sm:$0xff]   ;;  %vm517_vm3 = vcmask 523264   ;;  %vm2548_vm4 = vmmov 0  }
  0x3f   :  { %319 = vmatprep.subr.bf16.mxu0 %v168_v22  ;;  %v2277_v43 = vld [vmem:[#allocation5 + $0x18] sm:$0xff]   ;;  %v108_v11 = vsub.s32 6, %v2755_v7  ;;  %vm3367_vm5 = vmpackc.low %vm517_vm3, %vm517_vm3  ;;  %vm1932_vm6 = vcmask 516096  }
  0x40   :  { %1961 = vmatmul.mubr.msk.bf16.vlgmr.msra.gmra.mrb[0].mxu1 %vm135_vm2, %v72_v17  ;;  %v2773_v15 = vld [vmem:[%s3411_s2] ss:$2 sm:$0xff] }
  0x41   :  { %2105 = vmatpush3.bf16.msra.mxu1 %v171_v12  ;;  %288 = vmatprep.mubr.bf16.mxu1 %v2545_v0 }
  0x42   :  { %1957 = vmatmul.mubr.msk.bf16.vlgmr.msra.gmra.mrb[0].mxu0 %vm135_vm2, %v72_v17  ;;  %530 = vmatprep.subr.bf16.mxu1 %v2269_v35 }
  0x43   :  { %320 = vmatpush1.bf16.msra.mxu0 %v165_v25  ;;  %215 = vmatprep.mubr.bf16.mxu0 %v2545_v0 }
  0x44   :  { %2114 = vmatprep.subr.bf16.mxu0 %v2265_v33 }
  0x48   :  { %1962 = vmatmul.mubr.msk.bf16.gmra.mrb[4].mxu1 %vm135_vm2, %v73_v26 }
  0x49   :  { %298 = vmatprep.mubr.bf16.mxu1 %v2545_v0 }
  0x4a   :  { %1958 = vmatmul.mubr.msk.bf16.gmra.mrb[4].mxu0 %vm135_vm2, %v73_v26 }
  0x4b   :  { %225 = vmatprep.mubr.bf16.mxu0 %v2545_v0 }
  0x50   :  { %1963 = vmatmul.mubr.msk.bf16.gmra.mrb[8].mxu1 %vm135_vm2, %v74_v29 }
  0x51   :  { %308 = vmatprep.mubr.bf16.mxu1 %v2545_v0 }
  0x52   :  { %1959 = vmatmul.mubr.msk.bf16.gmra.mrb[8].mxu0 %vm135_vm2, %v74_v29 }
  0x53   :  { %235 = vmatprep.mubr.bf16.mxu0 %v2545_v0 }
  0x58   :  { %1964 = vmatmul.mubr.msk.bf16.gmra.mrb[12].mxu1 %vm135_vm2, %v75_v32 }
  0x59   :  { %2106 = vmatprep.mubr.msk.bf16.mxu1 %vm135_vm2, %v72_v17 }
  0x5a   :  { %1960 = vmatmul.mubr.msk.bf16.gmra.mrb[12].mxu0 %vm135_vm2, %v75_v32 }
  0x5b   :  { %351 = vmatprep.mubr.bf16.mxu0 %v2545_v0 }
  0x60   :  { %2107 = vmatmul.mubr.msk.bf16.vlgmr.msra.gmra.mrb[16].mxu1 %vm135_vm2, %v73_v26 }
  0x61   :  { %2110 = vmatprep.mubr.msk.bf16.mxu1 %vm135_vm2, %v74_v29  ;;  %531 = vmatpush1.bf16.msra.mxu1 %v2267_v36 }
  0x62   :  { %1965 = vmatmul.mubr.msk.bf16.vlgmr.msra.gmra.mrb[16].mxu0 %vm135_vm2, %v72_v17  ;;  %532 = vmatprep.subr.bf16.mxu1 %v2273_v37  ;;  %v109_v17 = vrot.slane %v2773_v15, %v108_v11 }
  0x63   :  { %361 = vmatprep.mubr.bf16.mxu0 %v2545_v0  ;;  %2115 = vmatpush3.bf16.msra.mxu0 %v2265_v33 }
  0x64   :  { %2116 = vmatprep.subr.bf16.mxu0 %v2266_v34 }
  0x65   :  { %533 = vmatpush1.bf16.msra.mxu1 %v2271_v39 }
  0x66   :  { %534 = vmatprep.subr.bf16.mxu1 %v2276_v40 }
  0x67   :  { %2117 = vmatpush3.bf16.msra.mxu0 %v2266_v34 }
  0x68   :  { %2111 = vmatmul.mubr.msk.bf16.gmra.mrb[20].mxu1 %vm135_vm2, %v75_v32  ;;  %2118 = vmatprep.subr.bf16.mxu0 %v2270_v38 }
  0x69   :  { %562 = vmatprep.mubr.bf16.mxu1 %v2545_v0  ;;  %535 = vmatpush1.bf16.msra.mxu1 %v2274_v41 }
  0x6a   :  { %1966 = vmatmul.mubr.msk.bf16.gmra.mrb[20].mxu0 %vm135_vm2, %v73_v26  ;;  %536 = vmatprep.subr.bf16.mxu1 %v2280_v42 }
  0x6b   :  { %371 = vmatprep.mubr.bf16.mxu0 %v2545_v0  ;;  %2119 = vmatpush3.bf16.msra.mxu0 %v2270_v38 }
  0x6c   :  { %2120 = vmatprep.subr.bf16.mxu0 %v2277_v43 }
  0x6d   :  { %537 = vmatpush1.bf16.msra.mxu1 %v2278_v44 }
  0x6f   :  { %2121 = vmatpush3.bf16.msra.mxu0 %v2277_v43 }
  0x72   :  { %1967 = vmatmul.mubr.msk.bf16.gmra.mrb[24].mxu0 %vm135_vm2, %v74_v29 }
  0x73   :  { %381 = vmatprep.mubr.bf16.mxu0 %v2545_v0 }
  0x7a   :  { %1968 = vmatmul.mubr.msk.bf16.gmra.mrb[28].mxu0 %vm135_vm2, %v75_v32 }
 0x113   :  { %v2707_v45 = vpop.f32.mrb[0].mxu1 }
 0x114   :  { %3416 = vst [vmem:[#allocation12_spill] sm:$0xff] %v2707_v45  ;;  %v2709_v46 = vpop.f32.mrb[1].mxu1 }
 0x115   :  { %v2711_v47 = vpop.f32.mrb[2].mxu1  ;;  %v2715_v49 = vpop.f32.mrb[0].mxu0 }
 0x116   :  { %3417 = vst [vmem:[#allocation13_spill] sm:$0xff] %v2711_v47  ;;  %v2713_v48 = vpop.f32.mrb[3].mxu1  ;;  %v2717_v50 = vpop.f32.mrb[1].mxu0 }
 0x117   :  { %v2719_v51 = vpop.f32.mrb[2].mxu0 }
 0x118   :  { %v2721_v52 = vpop.f32.mrb[3].mxu0 }
 0x11b   :  { %v2723_v53 = vpop.f32.mrb[4].mxu1 }
 0x11c   :  { %3418 = vst [vmem:[#allocation14_spill] sm:$0xff] %v2723_v53  ;;  %v2725_v54 = vpop.f32.mrb[5].mxu1 }
 0x11d   :  { %v2727_v55 = vpop.f32.mrb[6].mxu1  ;;  %v2731_v57 = vpop.f32.mrb[4].mxu0 }
 0x11e   :  { %3419 = vst [vmem:[#allocation15_spill] sm:$0xff] %v2727_v55  ;;  %v2729_v56 = vpop.f32.mrb[7].mxu1  ;;  %v2733_v58 = vpop.f32.mrb[5].mxu0 }
 0x11f   :  { %v2735_v59 = vpop.f32.mrb[6].mxu0 }
 0x120   :  { %v2737_v60 = vpop.f32.mrb[7].mxu0 }
 0x123   :  { %v2739_v61 = vpop.f32.mrb[8].mxu1 }
 0x124   :  { %3420 = vst [vmem:[#allocation16_spill] sm:$0xff] %v2739_v61  ;;  %v2741_v62 = vpop.f32.mrb[9].mxu1 }
 0x125   :  { %v2743_v63 = vpop.f32.mrb[10].mxu1  ;;  %v2747_v2 = vpop.f32.mrb[8].mxu0 }
 0x126   :  { %3421 = vst [vmem:[#allocation17_spill] sm:$0xff] %v2743_v63  ;;  %v2745_v1 = vpop.f32.mrb[11].mxu1  ;;  %v2749_v4 = vpop.f32.mrb[9].mxu0  ;;  %v84_v63 = vsub.s32 0, %v2755_v7 }
 0x127   :  { %v2751_v5 = vpop.f32.mrb[10].mxu0 }
 0x128   :  { %v2753_v6 = vpop.f32.mrb[11].mxu0  ;;  %v85_v61 = vrot.slane %v2773_v15, %v84_v63 }
 0x12b   :  { %v2757_v8 = vpop.f32.mrb[12].mxu1 }
 0x12c   :  { %3422 = vst [vmem:[#allocation18_spill] sm:$0xff] %v2757_v8  ;;  %v2759_v9 = vpop.f32.mrb[13].mxu1 }
 0x12d   :  { %v2761_v10 = vpop.f32.mrb[14].mxu1  ;;  %v2766_v13 = vpop.f32.mrb[12].mxu0 }
 0x12e   :  { %3423 = vst [vmem:[#allocation19_spill] sm:$0xff] %v2761_v10  ;;  %v2764_v12 = vpop.f32.mrb[15].mxu1  ;;  %v2768_v14 = vpop.f32.mrb[13].mxu0 }
 0x12f   :  { %v2775_v16 = vpop.f32.mrb[14].mxu0 }
 0x130   :  { %v2778_v18 = vpop.f32.mrb[15].mxu0 }
 0x133   :  { %v2108_v19 = vpop.f32.mrb[16].mxu1 }
 0x134   :  { %v426_v20 = vpop.f32.mrb[17].mxu1  ;;  %v435_v23 = vadd.f32 %v2108_v19, %v109_v17 }
 0x135   :  { %v427_v21 = vadd.f32 %v426_v20, %v109_v17  ;;  %v2109_v22 = vpop.f32.mrb[18].mxu1  ;;  %v2780_v26 = vpop.f32.mrb[16].mxu0 }
 0x136   :  { %v438_v24 = vadd.f32 %v2109_v22, %v109_v17  ;;  %v429_v25 = vpop.f32.mrb[19].mxu1  ;;  %v2782_v28 = vpop.f32.mrb[17].mxu0 }
 0x137   :  { %2301 = vtanh.f32 %v427_v21  ;;  %v430_v27 = vadd.f32 %v429_v25, %v109_v17  ;;  %v2784_v29 = vpop.f32.mrb[18].mxu0 }
 0x138   :  { %2303 = vtanh.f32 %v438_v24  ;;  %v2786_v30 = vpop.f32.mrb[19].mxu0 }
 0x139   :  { %2305 = vtanh.f32 %v430_v27 }
 0x13a   :  { %2307 = vtanh.f32 %v435_v23 }
 0x13b   :  { %v2112_v31 = vpop.f32.mrb[20].mxu1 }
 0x13c   :  { %v451_v32 = vadd.f32 %v2112_v31, %v109_v17  ;;  %v442_v33 = vpop.f32.mrb[21].mxu1 }
 0x13d   :  { %v443_v34 = vadd.f32 %v442_v33, %v109_v17  ;;  %v2113_v35 = vpop.f32.mrb[22].mxu1  ;;  %v2788_v38 = vpop.f32.mrb[20].mxu0 }
 0x13e   :  { %2309 = vtanh.f32 %v451_v32  ;;  %v454_v36 = vadd.f32 %v2113_v35, %v109_v17  ;;  %v445_v37 = vpop.f32.mrb[23].mxu1  ;;  %v2790_v40 = vpop.f32.mrb[21].mxu0 }
 0x13f   :  { %2311 = vtanh.f32 %v443_v34  ;;  %v446_v39 = vadd.f32 %v445_v37, %v109_v17  ;;  %v2792_v41 = vpop.f32.mrb[22].mxu0 }
 0x140   :  { %2313 = vtanh.f32 %v454_v36  ;;  %v2796_v43 = vpop.f32.mrb[23].mxu0 }
 0x141   :  { %v2794_v42 = vpop.eup %2301  ;;  %2315 = vtanh.f32 %v446_v39  ;;  %v2281_v39 = vld [vmem:[#allocation7] sm:$0xff]  }
 0x142   :  { %v2798_v44 = vpop.eup %2303  ;;  %2130 = vmatprep.subr.bf16.mxu0 %v2281_v39 }
 0x143   :  { %v2800_v3 = vpop.eup %2305 }
 0x144   :  { %v2802_v11 = vpop.eup %2307  ;;  %v465_v17 = vpack.c.bf16 %v2800_v3, %v2794_v42 }
 0x145   :  { %v466_v19 = vpack.c.bf16 %v2798_v44, %v2802_v11  ;;  %v2810_v20 = vpop.f32.mrb[24].mxu0 }
 0x146   :  { %1981 = vmatmul.mubr.msk.bf16.vlgmr.msra.gmra.mrb[24].mxu1 %vm517_vm3, %v465_v17  ;;  %2122 = vmatprep.mubr.msk.bf16.mxu0 %vm517_vm3, %v465_v17  ;;  %v2814_v21 = vpop.f32.mrb[25].mxu0  ;;  %v2282_v17 = vld [vmem:[#allocation7 + $0x8] sm:$0xff]  }
 0x147   :  { %2123 = vmatmul.mubr.msk.bf16.vlgmr.msra.gmra.mrb[32].mxu0 %vm517_vm3, %v466_v19  ;;  %572 = vmatprep.mubr.bf16.mxu1 %v2545_v0  ;;  %3424 = vst [vmem:[#allocation20_spill] sm:$0xff] %v2814_v21  ;;  %v2818_v23 = vpop.f32.mrb[26].mxu0 }
 0x148   :  { %v2816_v22 = vpop.eup %2309  ;;  %v2822_v25 = vpop.f32.mrb[27].mxu0  ;;  %2131 = vmatpush3.bf16.msra.mxu0 %v2281_v39 }
 0x149   :  { %v2820_v24 = vpop.eup %2311  ;;  %3425 = vst [vmem:[#allocation21_spill] sm:$0xff] %v2822_v25  ;;  %2132 = vmatprep.subr.bf16.mxu0 %v2282_v17 }
 0x14a   :  { %v2824_v27 = vpop.eup %2313 }
 0x14b   :  { %v2826_v31 = vpop.eup %2315  ;;  %v468_v32 = vpack.c.bf16 %v2824_v27, %v2816_v22 }
 0x14c   :  { %v467_v33 = vpack.c.bf16 %v2826_v31, %v2820_v24  ;;  %2133 = vmatpush3.bf16.msra.mxu0 %v2282_v17  ;;  %v208_v17 = vadd.f32 %v2715_v49, %v85_v61 }
 0x14d   :  { %v2834_v34 = vpop.f32.mrb[28].mxu0 }
 0x14e   :  { %1982 = vmatmul.mubr.msk.bf16.gmra.mrb[28].mxu1 %vm517_vm3, %v466_v19  ;;  %2126 = vmatprep.mubr.msk.bf16.mxu0 %vm517_vm3, %v467_v33  ;;  %v2838_v35 = vpop.f32.mrb[29].mxu0  ;;  %v96_v19 = vsub.s32 3, %v2755_v7 }
 0x14f   :  { %2127 = vmatmul.mubr.msk.bf16.gmra.mrb[36].mxu0 %vm517_vm3, %v468_v32  ;;  %582 = vmatprep.mubr.bf16.mxu1 %v2545_v0  ;;  %v2840_v36 = vpop.f32.mrb[30].mxu0 }
 0x150   :  { %v2842_v37 = vpop.f32.mrb[31].mxu0  ;;  %v2850_v10 = vrot.slane %v2773_v15, %v96_v19  ;;  %v222_v19 = vadd.f32 %v2735_v59, %v85_v61 }
 0x151   :  { %3426 = vst [vmem:[#allocation22_spill] sm:$0xff] %v2842_v37 }
 0x152   :  { %v287_v39 = vadd.f32 %v2713_v48, %v2850_v10 }
 0x156   :  { %1983 = vmatmul.mubr.msk.bf16.gmra.mrb[32].mxu1 %vm517_vm3, %v467_v33 }
 0x157   :  { %592 = vmatprep.mubr.bf16.mxu1 %v2545_v0  ;;  %v283_v0 = vadd.f32 %v2709_v46, %v2850_v10  ;;  %v212_v46 = vadd.f32 %v2719_v51, %v85_v61  ;;  %v297_v51 = vadd.f32 %v2729_v56, %v2850_v10 }
 0x15e   :  { %1984 = vmatmul.mubr.msk.bf16.gmra.mrb[36].mxu1 %vm517_vm3, %v468_v32  ;;  %v218_v32 = vadd.f32 %v2731_v57, %v85_v61 }
 0x219   :  { %v564_v33 = vpop.f32.mrb[24].mxu1 }
 0x21a   :  { %v2859_v8 = vadd.f32 %v564_v33, %v283_v0  ;;  %v2861_v47 = vpop.f32.mrb[25].mxu1  ;;  %v2124_v55 = vpop.f32.mrb[32].mxu0  ;;  %v2283_v33 = vld [vmem:[#allocation7 + $0x10] sm:$0xff]  }
 0x21b   :  { %3427 = vst [vmem:[#allocation23_spill] sm:$0xff] %v2861_v47  ;;  %v734_v45 = vadd.f32 %v2124_v55, %v218_v32  ;;  %v568_v63 = vpop.f32.mrb[26].mxu1  ;;  %v701_v53 = vpop.f32.mrb[33].mxu0  ;;  %v293_v47 = vadd.f32 %v2725_v54, %v2850_v10  ;;  %2134 = vmatprep.subr.bf16.mxu0 %v2283_v33  ;;  %v238_v55 = vadd.f32 %v2766_v13, %v85_v61 }
 0x21c   :  { %v2865_v25 = vadd.f32 %v568_v63, %v287_v39  ;;  %v732_v57 = vadd.f32 %v701_v53, %v208_v17  ;;  %v2867_v21 = vpop.f32.mrb[27].mxu1  ;;  %v2125_v48 = vpop.f32.mrb[34].mxu0  ;;  %2135 = vmatpush3.bf16.msra.mxu0 %v2283_v33  ;;  %v228_v53 = vadd.f32 %v2747_v2, %v85_v61  ;;  %v2284_v17 = vld [vmem:[#allocation7 + $0x18] sm:$0xff]   ;;  %v242_v54 = vadd.f32 %v2775_v16, %v85_v61 }
 0x21d   :  { %v735_v37 = vadd.f32 %v2125_v48, %v222_v19  ;;  %v704_v49 = vpop.f32.mrb[35].mxu0  ;;  %2317 = vtanh.f32 %v734_v45  ;;  %v232_v13 = vadd.f32 %v2751_v5, %v85_v61  ;;  %2136 = vmatprep.subr.bf16.mxu0 %v2284_v17  ;;  %v303_v16 = vadd.f32 %v2741_v62, %v2850_v10 }
 0x21e   :  { %v733_v0 = vadd.f32 %v704_v49, %v212_v46  ;;  %2319 = vtanh.f32 %v732_v57 }
 0x21f   :  { %2321 = vtanh.f32 %v735_v37 }
 0x220   :  { %2323 = vtanh.f32 %v733_v0  ;;  %2137 = vmatpush3.bf16.msra.mxu0 %v2284_v17  ;;  %v307_v0 = vadd.f32 %v2745_v1, %v2850_v10  ;;  %v313_v17 = vadd.f32 %v2759_v9, %v2850_v10 }
 0x221   :  { %v574_v59 = vpop.f32.mrb[28].mxu1 }
 0x222   :  { %v2875_v32 = vadd.f32 %v574_v59, %v293_v47  ;;  %v2877_v45 = vpop.f32.mrb[29].mxu1  ;;  %v2128_v39 = vpop.f32.mrb[36].mxu0 }
 0x223   :  { %3428 = vst [vmem:[#allocation24_spill] sm:$0xff] %v2877_v45  ;;  %v738_v19 = vadd.f32 %v2128_v39, %v238_v55  ;;  %v578_v63 = vpop.f32.mrb[30].mxu1  ;;  %v717_v46 = vpop.f32.mrb[37].mxu0 }
 0x224   :  { %v2881_v57 = vadd.f32 %v578_v63, %v297_v51  ;;  %v736_v56 = vadd.f32 %v717_v46, %v228_v53  ;;  %v2883_v48 = vpop.f32.mrb[31].mxu1  ;;  %v2129_v2 = vpop.f32.mrb[38].mxu0 }
 0x225   :  { %3429 = vst [vmem:[#allocation25_spill] sm:$0xff] %v2883_v48  ;;  %v739_v47 = vadd.f32 %v2129_v2, %v242_v54  ;;  %v720_v37 = vpop.f32.mrb[39].mxu0 }
 0x226   :  { %v737_v49 = vadd.f32 %v720_v37, %v232_v13  ;;  %2325 = vtanh.f32 %v736_v56 }
 0x227   :  { %v2885_v33 = vpop.eup %2317 }
 0x228   :  { %760 = vrot.lane.b32.xlu1 %v2885_v33, %s2541_s7  ;;  %v2891_v5 = vpop.eup %2319  ;;  %2327 = vtanh.f32 %v737_v49 }
 0x229   :  { %v584_v61 = vpop.f32.mrb[32].mxu1  ;;  %756 = vrot.lane.b32.xlu0 %v2891_v5, %s2541_s7  ;;  %v2901_v62 = vpop.eup %2321  ;;  %2329 = vtanh.f32 %v738_v19  ;;  %v317_v19 = vadd.f32 %v2764_v12, %v2850_v10 }
 0x22a   :  { %v2895_v55 = vadd.f32 %v584_v61, %v303_v16  ;;  %v2897_v59 = vpop.f32.mrb[33].mxu1  ;;  %v2909_v1 = vpop.eup %2323  ;;  %2331 = vtanh.f32 %v739_v47 }
 0x22b   :  { %3430 = vst [vmem:[#allocation26_spill] sm:$0xff] %v2897_v59  ;;  %v588_v51 = vpop.f32.mrb[34].mxu1 }
 0x22c   :  { %v2903_v53 = vadd.f32 %v588_v51, %v307_v0  ;;  %v2905_v39 = vpop.f32.mrb[35].mxu1  ;;  %762 = vrot.lane.b32.xlu1 %v2901_v62, %s2541_s7 }
 0x22d   :  { %3431 = vst [vmem:[#allocation27_spill] sm:$0xff] %v2905_v39  ;;  %758 = vrot.lane.b32.xlu0 %v2909_v1, %s2541_s7 }
 0x230   :  { %v2915_v63 = vpop.eup %2325 }
 0x231   :  { %v594_v54 = vpop.f32.mrb[36].mxu1  ;;  %764 = vrot.lane.b32.xlu0 %v2915_v63, %s2541_s7 }
 0x232   :  { %v2919_v46 = vadd.f32 %v594_v54, %v313_v17  ;;  %v2921_v13 = vpop.f32.mrb[37].mxu1  ;;  %v2929_v37 = vpop.eup %2327 }
 0x233   :  { %3432 = vst [vmem:[#allocation28_spill] sm:$0xff] %v2921_v13  ;;  %v598_v56 = vpop.f32.mrb[38].mxu1  ;;  %v2931_v9 = vpop.eup %2329  ;;  %766 = vrot.lane.b32.xlu1 %v2929_v37, %s2541_s7 }
 0x234   :  { %v2925_v2 = vadd.f32 %v598_v56, %v317_v19  ;;  %v2927_v47 = vpop.f32.mrb[39].mxu1  ;;  %v2937_v10 = vpop.eup %2331 }
 0x235   :  { %3433 = vst [vmem:[#allocation29_spill] sm:$0xff] %v2927_v47  ;;  %768 = vrot.lane.b32.xlu0 %v2931_v9, %s2541_s7 }
 0x237   :  { %770 = vrot.lane.b32.xlu1 %v2937_v10, %s2541_s7 }
 0x29a   :  { %v761_v12 = vpop.permute.xlu1 %760 }
 0x29b   :  { %v757_v49 = vpop.permute.xlu0 %756  ;;  %v782_v54 = vmul.f32 %v2802_v11, %v761_v12 }
 0x29c   :  { %v780_v51 = vmul.f32 %v2794_v42, %v757_v49 }
 0x29e   :  { %v763_v16 = vpop.permute.xlu1 %762 }
 0x29f   :  { %v783_v61 = vmul.f32 %v2798_v44, %v763_v16  ;;  %v759_v0 = vpop.permute.xlu0 %758 }
 0x2a0   :  { %v781_v17 = vmul.f32 %v2800_v3, %v759_v0 }
 0x2a1   :  { %v789_v56 = vpack.c.bf16 %v783_v61, %v782_v54  ;;  %v2286_v54 = vld [vmem:[#allocation5 + $0x28] sm:$0xff]  }
 0x2a2   :  { %v788_v19 = vpack.c.bf16 %v781_v17, %v780_v51 }
 0x2a3   :  { %v765_v47 = vpop.permute.xlu0 %764 }
 0x2a4   :  { %2138 = vmatprep.mubr.msk.bf16.mxu0 %vm517_vm3, %v788_v19  ;;  %v784_v39 = vmul.f32 %v2820_v24, %v765_v47  ;;  %v2287_v19 = vld [vmem:[#allocation5 + $0x30] sm:$0xff]  }
 0x2a5   :  { %2139 = vmatmul.mubr.msk.bf16.vlgmr.msra.gmra.mrb[40].mxu0 %vm517_vm3, %v789_v56  ;;  %v767_v13 = vpop.permute.xlu1 %766  ;;  %v100_v56 = vsub.s32 4, %v2755_v7 }
 0x2a6   :  { %v785_v59 = vmul.f32 %v2826_v31, %v767_v13  ;;  %v2285_v13 = vld [vmem:[#allocation5 + $0x20] sm:$0xff]  }
 0x2a7   :  { %v769_v16 = vpop.permute.xlu0 %768  ;;  %2146 = vmatprep.subr.bf16.mxu1 %v2285_v13 }
 0x2a8   :  { %v790_v48 = vpack.c.bf16 %v785_v59, %v784_v39  ;;  %v786_v49 = vmul.f32 %v2816_v22, %v769_v16  ;;  %2147 = vmatpush3.bf16.msra.mxu1 %v2285_v13  ;;  %v101_v16 = vrot.slane %v2773_v15, %v100_v56 }
 0x2a9   :  { %v771_v45 = vpop.permute.xlu1 %770  ;;  %2148 = vmatprep.subr.bf16.mxu1 %v2286_v54 }
 0x2aa   :  { %v787_v0 = vmul.f32 %v2824_v27, %v771_v45  ;;  %2142 = vmatprep.mubr.msk.bf16.mxu0 %vm517_vm3, %v790_v48  ;;  %v2980_v13 = vadd.f32 %v2810_v20, %v101_v16 }
 0x2ac   :  { %v791_v12 = vpack.c.bf16 %v787_v0, %v786_v49  ;;  %2149 = vmatpush3.bf16.msra.mxu1 %v2286_v54  ;;  %v2964_v49 = vadd.f32 %v2780_v26, %v101_v16  ;;  %v2983_v54 = vadd.f32 %v2818_v23, %v101_v16 }
 0x2ad   :  { %2150 = vmatprep.subr.bf16.mxu1 %v2287_v19 }
 0x2ae   :  { %2143 = vmatmul.mubr.msk.bf16.gmra.mrb[44].mxu0 %vm517_vm3, %v791_v12  ;;  %v2967_v12 = vadd.f32 %v2784_v29, %v101_v16 }
 0x2b0   :  { %2151 = vmatpush3.bf16.msra.mxu1 %v2287_v19 }
 0x378   :  { %v2140_v61 = vpop.f32.mrb[40].mxu0 }
 0x379   :  { %v870_v51 = vpop.f32.mrb[41].mxu0 }
 0x37a   :  { %909 = vrot.lane.b32.xlu0 %v870_v51, %s2541_s7  ;;  %v2141_v17 = vpop.f32.mrb[42].mxu0 }
 0x37b   :  { %v873_v47 = vpop.f32.mrb[43].mxu0 }
 0x37c   :  { %911 = vrot.lane.b32.xlu1 %v873_v47, %s2541_s7 }
 0x37e   :  { %913 = vrot.lane.b32.xlu0 %v2140_v61, %s2541_s7 }
 0x380   :  { %915 = vrot.lane.b32.xlu1 %v2141_v17, %s2541_s7  ;;  %v2971_v17 = vadd.f32 %v2788_v38, %v101_v16 }
 0x381   :  { %v2144_v59 = vpop.f32.mrb[44].mxu0 }
 0x382   :  { %v886_v39 = vpop.f32.mrb[45].mxu0 }
 0x383   :  { %917 = vrot.lane.b32.xlu0 %v886_v39, %s2541_s7  ;;  %v2145_v45 = vpop.f32.mrb[46].mxu0  ;;  %v2975_v39 = vadd.f32 %v2792_v41, %v101_v16 }
 0x384   :  { %v889_v48 = vpop.f32.mrb[47].mxu0 }
 0x385   :  { %919 = vrot.lane.b32.xlu1 %v889_v48, %s2541_s7  ;;  %v2288_v48 = vld [vmem:[#allocation5 + $0x38] sm:$0xff]  }
 0x386   :  { %2152 = vmatprep.subr.bf16.mxu1 %v2288_v48 }
 0x387   :  { %921 = vrot.lane.b32.xlu0 %v2144_v59, %s2541_s7  ;;  %2153 = vmatpush3.bf16.msra.mxu1 %v2288_v48 }
 0x389   :  { %923 = vrot.lane.b32.xlu1 %v2145_v45, %s2541_s7 }
 0x3ec   :  { %v910_v0 = vpop.permute.xlu0 %909 }
 0x3ed   :  { %v933_v61 = vadd.f32 %v910_v0, %v2964_v49  ;;  %v2987_v0 = vadd.f32 %v2834_v34, %v101_v16 }
 0x3ee   :  { %v912_v51 = vpop.permute.xlu1 %911 }
 0x3ef   :  { %2333 = vtanh.f32 %v933_v61  ;;  %v934_v47 = vadd.f32 %v912_v51, %v2967_v12 }
 0x3f0   :  { %v914_v59 = vpop.permute.xlu0 %913 }
 0x3f1   :  { %2335 = vtanh.f32 %v934_v47  ;;  %v935_v26 = vadd.f32 %v914_v59, %v2971_v17  ;;  %v2992_v47 = vadd.f32 %v2840_v36, %v101_v16 }
 0x3f2   :  { %v916_v45 = vpop.permute.xlu1 %915 }
 0x3f3   :  { %2337 = vtanh.f32 %v935_v26  ;;  %v936_v29 = vadd.f32 %v916_v45, %v2975_v39 }
 0x3f5   :  { %2339 = vtanh.f32 %v936_v29  ;;  %v918_v38 = vpop.permute.xlu0 %917 }
 0x3f6   :  { %v937_v41 = vadd.f32 %v918_v38, %v2980_v13 }
 0x3f7   :  { %v920_v19 = vpop.permute.xlu1 %919 }
 0x3f8   :  { %2341 = vtanh.f32 %v937_v41  ;;  %v938_v61 = vadd.f32 %v920_v19, %v2983_v54 }
 0x3f9   :  { %v2334_v56 = vpop.eup %2333  ;;  %v922_v51 = vpop.permute.xlu0 %921 }
 0x3fa   :  { %965 = vrot.lane.b32.xlu0 %v2334_v56, %s2541_s7  ;;  %2343 = vtanh.f32 %v938_v61  ;;  %v939_v23 = vadd.f32 %v922_v51, %v2987_v0  ;;  %v998_v61 = vmul.f32 %v2909_v1, %v2800_v3  ;;  %v1000_v1 = vmul.f32 %v2901_v62, %v2798_v44 }
 0x3fb   :  { %v2336_v20 = vpop.eup %2335  ;;  %v924_v59 = vpop.permute.xlu1 %923 }
 0x3fc   :  { %967 = vrot.lane.b32.xlu1 %v2336_v20, %s2541_s7  ;;  %2345 = vtanh.f32 %v939_v23  ;;  %v940_v34 = vadd.f32 %v924_v59, %v2992_v47 }
 0x3fd   :  { %v2338_v26 = vpop.eup %2337 }
 0x3fe   :  { %969 = vrot.lane.b32.xlu0 %v2338_v26, %s2541_s7  ;;  %2347 = vtanh.f32 %v940_v34 }
 0x3ff   :  { %v2340_v45 = vpop.eup %2339  ;;  %2349 = vtanh.f32 %v2859_v8 }
 0x400   :  { %971 = vrot.lane.b32.xlu1 %v2340_v45, %s2541_s7  ;;  %2351 = vtanh.f32 %v2865_v25 }
 0x401   :  { %2353 = vtanh.f32 %v2875_v32 }
 0x402   :  { %v2342_v29 = vpop.eup %2341  ;;  %2355 = vtanh.f32 %v2881_v57 }
 0x403   :  { %973 = vrot.lane.b32.xlu0 %v2342_v29, %s2541_s7  ;;  %2357 = vtanh.f32 %v2895_v55 }
 0x404   :  { %v2344_v36 = vpop.eup %2343  ;;  %2359 = vtanh.f32 %v2903_v53  ;;  %v997_v53 = vmul.f32 %v2891_v5, %v2794_v42  ;;  %v999_v5 = vmul.f32 %v2885_v33, %v2802_v11 }
 0x405   :  { %975 = vrot.lane.b32.xlu1 %v2344_v36, %s2541_s7  ;;  %2361 = vtanh.f32 %v2919_v46 }
 0x406   :  { %v2346_v16 = vpop.eup %2345  ;;  %2363 = vtanh.f32 %v2925_v2 }
 0x407   :  { %977 = vrot.lane.b32.xlu0 %v2346_v16, %s2541_s7 }
 0x408   :  { %v2348_v48 = vpop.eup %2347 }
 0x409   :  { %979 = vrot.lane.b32.xlu1 %v2348_v48, %s2541_s7  ;;  %v3007_v38 = vpop.eup %2349 }
 0x40a   :  { %v3010_v41 = vpop.eup %2351  ;;  %v949_v19 = vsub.f32 1.0, %v3007_v38 }
 0x40b   :  { %v3014_v56 = vpop.eup %2353  ;;  %v950_v32 = vsub.f32 1.0, %v3010_v41 }
 0x40c   :  { %v3020_v57 = vpop.eup %2355  ;;  %v951_v51 = vsub.f32 1.0, %v3014_v56 }
 0x40d   :  { %v952_v26 = vsub.f32 1.0, %v3020_v57  ;;  %v3037_v34 = vpop.eup %2357 }
 0x40e   :  { %v3047_v29 = vpop.eup %2359  ;;  %v953_v48 = vsub.f32 1.0, %v3037_v34 }
 0x40f   :  { %v954_v33 = vsub.f32 1.0, %v3047_v29 }
 0x46c   :  { %v966_v8 = vpop.permute.xlu0 %965 }
 0x46d   :  { %v989_v25 = vmul.f32 %v966_v8, %v949_v19  ;;  %v3055_v8 = vpop.eup %2361 }
 0x46e   :  { %v968_v55 = vpop.permute.xlu1 %967  ;;  %v3062_v62 = vpop.eup %2363 }
 0x46f   :  { %v990_v46 = vmul.f32 %v968_v55, %v950_v32  ;;  %v3030_v23 = vadd.f32 %v997_v53, %v989_v25  ;;  %v1001_v53 = vmul.f32 %v2915_v63, %v2820_v24  ;;  %v956_v24 = vsub.f32 1.0, %v3062_v62 }
 0x470   :  { %v970_v20 = vpop.permute.xlu0 %969 }
 0x471   :  { %v3032_v59 = vadd.f32 %v998_v61, %v990_v46  ;;  %v991_v2 = vmul.f32 %v970_v20, %v951_v51  ;;  %v1002_v61 = vmul.f32 %v2929_v37, %v2826_v31  ;;  %v955_v20 = vsub.f32 1.0, %v3055_v8 }
 0x472   :  { %v972_v42 = vpop.permute.xlu1 %971  ;;  %v1003_v37 = vmul.f32 %v2931_v9, %v2816_v22  ;;  %v88_v22 = vsub.s32 1, %v2755_v7 }
 0x473   :  { %v1013_v3 = vpack.c.bf16 %v3032_v59, %v3030_v23  ;;  %v992_v45 = vmul.f32 %v972_v42, %v952_v26  ;;  %v3049_v36 = vadd.f32 %v999_v5, %v991_v2 }
 0x475   :  { %v3051_v16 = vadd.f32 %v1000_v1, %v992_v45  ;;  %2154 = vmatprep.mubr.msk.bf16.mxu1 %vm517_vm3, %v1013_v3  ;;  %v974_v25 = vpop.permute.xlu0 %973  ;;  %v1004_v1 = vmul.f32 %v2937_v10, %v2824_v27  ;;  %v89_v27 = vrot.slane %v2773_v15, %v88_v22 }
 0x476   :  { %v993_v44 = vmul.f32 %v974_v25, %v953_v48 }
 0x477   :  { %v1014_v11 = vpack.c.bf16 %v3051_v16, %v3049_v36  ;;  %v976_v55 = vpop.permute.xlu1 %975  ;;  %v220_v9 = vadd.f32 %v2733_v58, %v89_v27  ;;  %v210_v10 = vadd.f32 %v2717_v50, %v89_v27  ;;  %v2292_v58 = vld [vmem:[#allocation7 + $0x38] sm:$0xff]   ;;  %v240_v50 = vadd.f32 %v2768_v14, %v89_v27 }
 0x478   :  { %v994_v46 = vmul.f32 %v976_v55, %v954_v33  ;;  %v3072_v42 = vadd.f32 %v1001_v53, %v993_v44  ;;  %v2289_v55 = vld [vmem:[#allocation7 + $0x20] sm:$0xff]   ;;  %v2290_v53 = vld [vmem:[#allocation7 + $0x28] sm:$0xff]  }
 0x479   :  { %2155 = vmatmul.mubr.msk.bf16.vlgmr.msra.gmra.mrb[40].mxu1 %vm517_vm3, %v1014_v11  ;;  %v978_v2 = vpop.permute.xlu0 %977  ;;  %2162 = vmatprep.subr.bf16.mxu0 %v2289_v55 }
 0x47a   :  { %v3074_v3 = vadd.f32 %v1002_v61, %v994_v46  ;;  %v995_v5 = vmul.f32 %v978_v2, %v955_v20  ;;  %2163 = vmatpush3.bf16.msra.mxu0 %v2289_v55  ;;  %v224_v46 = vadd.f32 %v2737_v60, %v89_v27  ;;  %v230_v60 = vadd.f32 %v2749_v4, %v89_v27 }
 0x47b   :  { %v980_v63 = vpop.permute.xlu1 %979  ;;  %2164 = vmatprep.subr.bf16.mxu0 %v2290_v53 }
 0x47c   :  { %v1015_v31 = vpack.c.bf16 %v3074_v3, %v3072_v42  ;;  %v996_v45 = vmul.f32 %v980_v63, %v956_v24  ;;  %v3087_v25 = vadd.f32 %v1003_v37, %v995_v5  ;;  %v214_v63 = vadd.f32 %v2721_v52, %v89_v27 }
 0x47d   :  { %v244_v52 = vadd.f32 %v2778_v18, %v89_v27 }
 0x47e   :  { %v3089_v11 = vadd.f32 %v1004_v1, %v996_v45  ;;  %2158 = vmatprep.mubr.msk.bf16.mxu1 %vm517_vm3, %v1015_v31  ;;  %2165 = vmatpush3.bf16.msra.mxu0 %v2290_v53 }
 0x480   :  { %v1016_v44 = vpack.c.bf16 %v3089_v11, %v3087_v25 }
 0x482   :  { %2159 = vmatmul.mubr.msk.bf16.gmra.mrb[44].mxu1 %vm517_vm3, %v1016_v44  ;;  %v2291_v44 = vld [vmem:[#allocation7 + $0x30] sm:$0xff]  }
 0x483   :  { %2166 = vmatprep.subr.bf16.mxu0 %v2291_v44 }
 0x484   :  { %2167 = vmatpush3.bf16.msra.mxu0 %v2291_v44 }
 0x485   :  { %2168 = vmatprep.subr.bf16.mxu0 %v2292_v58 }
 0x488   :  { %2169 = vmatpush3.bf16.msra.mxu0 %v2292_v58 }
 0x54c   :  { %v2156_v61 = vpop.f32.mrb[40].mxu1 }
 0x54d   :  { %v1129_v2 = vadd.f32 %v2156_v61, %v220_v9  ;;  %v1096_v5 = vpop.f32.mrb[41].mxu1 }
 0x54e   :  { %v1127_v31 = vadd.f32 %v1096_v5, %v210_v10  ;;  %v2157_v37 = vpop.f32.mrb[42].mxu1  ;;  %v234_v10 = vadd.f32 %v2753_v6, %v89_v27 }
 0x54f   :  { %v1130_v1 = vadd.f32 %v2157_v37, %v224_v46  ;;  %v1099_v45 = vpop.f32.mrb[43].mxu1 }
 0x550   :  { %2365 = vtanh.f32 %v1127_v31  ;;  %v1128_v55 = vadd.f32 %v1099_v45, %v214_v63 }
 0x552   :  { %2367 = vtanh.f32 %v1128_v55 }
 0x553   :  { %2369 = vtanh.f32 %v1129_v2 }
 0x554   :  { %2371 = vtanh.f32 %v1130_v1 }
 0x555   :  { %v2160_v53 = vpop.f32.mrb[44].mxu1 }
 0x556   :  { %v1133_v22 = vadd.f32 %v2160_v53, %v240_v50  ;;  %v1112_v9 = vpop.f32.mrb[45].mxu1 }
 0x557   :  { %v1131_v61 = vadd.f32 %v1112_v9, %v230_v60  ;;  %v2161_v46 = vpop.f32.mrb[46].mxu1 }
 0x558   :  { %v1134_v5 = vadd.f32 %v2161_v46, %v244_v52  ;;  %v1115_v63 = vpop.f32.mrb[47].mxu1 }
 0x559   :  { %2373 = vtanh.f32 %v1131_v61  ;;  %v1132_v2 = vadd.f32 %v1115_v63, %v234_v10 }
 0x55a   :  { %v2366_v31 = vpop.eup %2365 }
 0x55b   :  { %1151 = vrot.lane.b32.xlu0 %v2366_v31, %s2541_s7  ;;  %2375 = vtanh.f32 %v1132_v2  ;;  %v1353_v45 = vmul.f32 %v2366_v31, %v3030_v23 }
 0x55c   :  { %v2368_v14 = vpop.eup %2367  ;;  %2377 = vtanh.f32 %v1133_v22 }
 0x55d   :  { %1153 = vrot.lane.b32.xlu1 %v2368_v14, %s2541_s7  ;;  %v3107_v4 = vpop.eup %2369  ;;  %2379 = vtanh.f32 %v1134_v5  ;;  %v1354_v44 = vmul.f32 %v2368_v14, %v3032_v59 }
 0x55e   :  { %v3111_v6 = vpop.eup %2371 }
 0x55f   :  { %1155 = vrot.lane.b32.xlu0 %v3107_v4, %s2541_s7 }
 0x561   :  { %1157 = vrot.lane.b32.xlu1 %v3111_v6, %s2541_s7 }
 0x563   :  { %v3115_v18 = vpop.eup %2373 }
 0x564   :  { %1159 = vrot.lane.b32.xlu0 %v3115_v18, %s2541_s7 }
 0x565   :  { %v3119_v27 = vpop.eup %2375 }
 0x566   :  { %1161 = vrot.lane.b32.xlu1 %v3119_v27, %s2541_s7  ;;  %v3123_v37 = vpop.eup %2377 }
 0x567   :  { %v3127_v1 = vpop.eup %2379 }
 0x568   :  { %1163 = vrot.lane.b32.xlu0 %v3123_v37, %s2541_s7 }
 0x56a   :  { %1165 = vrot.lane.b32.xlu1 %v3127_v1, %s2541_s7 }
 0x56c   :  { %1369 = vrot.lane.b32.xlu0 %v1353_v45, %s2541_s7 }
 0x56e   :  { %1371 = vrot.lane.b32.xlu1 %v1354_v44, %s2541_s7 }
 0x5cd   :  { %v1152_v55 = vpop.permute.xlu0 %1151 }
 0x5ce   :  { %v1175_v50 = vmul.f32 %v1152_v55, %v3030_v23  ;;  %v104_v55 = vsub.s32 5, %v2755_v7 }
 0x5cf   :  { %v1154_v58 = vpop.permute.xlu1 %1153 }
 0x5d0   :  { %v1176_v60 = vmul.f32 %v1154_v58, %v3032_v59  ;;  %v105_v58 = vrot.slane %v2773_v15, %v104_v55  ;;  %v3435_v55 = vld [vmem:[#allocation20_spill] sm:$0xff] }
 0x5d1   :  { %v1156_v53 = vpop.permute.xlu0 %1155 }
 0x5d2   :  { %v1183_v52 = vpack.c.bf16 %v1176_v60, %v1175_v50  ;;  %v1177_v9 = vmul.f32 %v1156_v53, %v3049_v36  ;;  %v3150_v50 = vadd.f32 %v2790_v40, %v105_v58  ;;  %v3153_v53 = vadd.f32 %v2782_v28, %v105_v58 }
 0x5d3   :  { %v1158_v22 = vpop.permute.xlu1 %1157 }
 0x5d4   :  { %v1178_v10 = vmul.f32 %v1158_v22, %v3051_v16  ;;  %2170 = vmatprep.mubr.msk.bf16.mxu0 %vm517_vm3, %v1183_v52  ;;  %v3156_v52 = vadd.f32 %v2796_v43, %v105_v58 }
 0x5d6   :  { %v1184_v61 = vpack.c.bf16 %v1178_v10, %v1177_v9  ;;  %v1160_v46 = vpop.permute.xlu0 %1159 }
 0x5d7   :  { %v1179_v63 = vmul.f32 %v1160_v46, %v3072_v42 }
 0x5d8   :  { %2171 = vmatmul.mubr.msk.bf16.vlgmr.msra.gmra.mrb[48].mxu0 %vm517_vm3, %v1184_v61  ;;  %v1162_v5 = vpop.permute.xlu1 %1161  ;;  %v3160_v61 = vadd.f32 %v2786_v30, %v105_v58 }
 0x5d9   :  { %v1180_v23 = vmul.f32 %v1162_v5, %v3074_v3 }
 0x5da   :  { %v1164_v31 = vpop.permute.xlu0 %1163 }
 0x5db   :  { %v1185_v59 = vpack.c.bf16 %v1180_v23, %v1179_v63  ;;  %v1181_v14 = vmul.f32 %v1164_v31, %v3087_v25  ;;  %v3166_v31 = vadd.f32 %v2838_v35, %v105_v58 }
 0x5dc   :  { %v1166_v2 = vpop.permute.xlu1 %1165 }
 0x5dd   :  { %v1182_v45 = vmul.f32 %v1166_v2, %v3089_v11  ;;  %2174 = vmatprep.mubr.msk.bf16.mxu0 %vm517_vm3, %v1185_v59  ;;  %v3434_v2 = vld [vmem:[#allocation22_spill] sm:$0xff] }
 0x5df   :  { %v1186_v44 = vpack.c.bf16 %v1182_v45, %v1181_v14  ;;  %v3170_v14 = vadd.f32 %v3434_v2, %v105_v58 }
 0x5e1   :  { %2175 = vmatmul.mubr.msk.bf16.gmra.mrb[52].mxu0 %vm517_vm3, %v1186_v44 }
 0x6ab   :  { %v2172_v60 = vpop.f32.mrb[48].mxu0 }
 0x6ac   :  { %v1299_v22 = vadd.f32 %v2172_v60, %v3150_v50  ;;  %v1266_v9 = vpop.f32.mrb[49].mxu0  ;;  %v3175_v60 = vadd.f32 %v3435_v55, %v105_v58 }
 0x6ad   :  { %v2173_v10 = vpop.f32.mrb[50].mxu0  ;;  %v1297_v15 = vadd.f32 %v1266_v9, %v3153_v53  ;;  %v3436_v9 = vld [vmem:[#allocation21_spill] sm:$0xff] }
 0x6ae   :  { %2381 = vtanh.f32 %v1299_v22  ;;  %v1300_v40 = vadd.f32 %v2173_v10, %v3156_v52  ;;  %v1269_v46 = vpop.f32.mrb[51].mxu0  ;;  %v3180_v10 = vadd.f32 %v3436_v9, %v105_v58  ;;  %v1357_v58 = vmul.f32 %v3115_v18, %v3072_v42  ;;  %v2295_v18 = vld [vmem:[#allocation5 + $0x50] sm:$0xff]  }
 0x6af   :  { %v1298_v28 = vadd.f32 %v1269_v46, %v3160_v61 }
 0x6b0   :  { %2383 = vtanh.f32 %v1300_v40  ;;  %v1355_v40 = vmul.f32 %v3107_v4, %v3049_v36  ;;  %v1358_v36 = vmul.f32 %v3119_v27, %v3074_v3  ;;  %v1359_v3 = vmul.f32 %v3123_v37, %v3087_v25 }
 0x6b1   :  { %2385 = vtanh.f32 %v1297_v15  ;;  %v1360_v27 = vmul.f32 %v3127_v1, %v3089_v11 }
 0x6b2   :  { %2387 = vtanh.f32 %v1298_v28  ;;  %v1356_v28 = vmul.f32 %v3111_v6, %v3051_v16  ;;  %v2294_v16 = vld [vmem:[#allocation5 + $0x48] sm:$0xff]  }
 0x6b4   :  { %v2176_v43 = vpop.f32.mrb[52].mxu0 }
 0x6b5   :  { %v1282_v5 = vpop.f32.mrb[53].mxu0  ;;  %v1303_v45 = vadd.f32 %v2176_v43, %v3166_v31 }
 0x6b6   :  { %v2177_v63 = vpop.f32.mrb[54].mxu0  ;;  %v1301_v15 = vadd.f32 %v1282_v5, %v3175_v60  ;;  %v2293_v5 = vld [vmem:[#allocation5 + $0x40] sm:$0xff]  }
 0x6b7   :  { %v1285_v30 = vpop.f32.mrb[55].mxu0  ;;  %v1304_v22 = vadd.f32 %v2177_v63, %v3170_v14  ;;  %2389 = vtanh.f32 %v1303_v45  ;;  %2178 = vmatprep.subr.bf16.mxu1 %v2293_v5  ;;  %v2296_v63 = vld [vmem:[#allocation5 + $0x58] sm:$0xff]  }
 0x6b8   :  { %v2382_v23 = vpop.eup %2381  ;;  %v1302_v46 = vadd.f32 %v1285_v30, %v3180_v10  ;;  %2179 = vmatpush3.bf16.msra.mxu1 %v2293_v5  ;;  %v1372_v30 = vpop.permute.xlu1 %1371 }
 0x6b9   :  { %1325 = vrot.lane.b32.xlu0 %v2382_v23, %s2541_s7  ;;  %2391 = vtanh.f32 %v1304_v22  ;;  %2180 = vmatprep.subr.bf16.mxu1 %v2294_v16  ;;  %v1370_v23 = vpop.permute.xlu0 %1369 }
 0x6ba   :  { %v2384_v59 = vpop.eup %2383  ;;  %2393 = vtanh.f32 %v1301_v15 }
 0x6bb   :  { %1327 = vrot.lane.b32.xlu1 %v2384_v59, %s2541_s7  ;;  %v2386_v44 = vpop.eup %2385  ;;  %2395 = vtanh.f32 %v1302_v46 }
 0x6bc   :  { %v2388_v35 = vpop.eup %2387  ;;  %2181 = vmatpush3.bf16.msra.mxu1 %v2294_v16 }
 0x6bd   :  { %1321 = vrot.lane.b32.xlu0 %v2386_v44, %s2541_s7  ;;  %2182 = vmatprep.subr.bf16.mxu1 %v2295_v18 }
 0x6bf   :  { %1323 = vrot.lane.b32.xlu1 %v2388_v35, %s2541_s7 }
 0x6c0   :  { %2183 = vmatpush3.bf16.msra.mxu1 %v2295_v18  ;;  %v2299_v18 = vld [vmem:[#allocation7 + $0x50] sm:$0xff]  }
 0x6c1   :  { %1373 = vrot.lane.b32.xlu0 %v1355_v40, %s2541_s7  ;;  %v2390_v4 = vpop.eup %2389  ;;  %2184 = vmatprep.subr.bf16.mxu1 %v2296_v63 }
 0x6c3   :  { %1375 = vrot.lane.b32.xlu1 %v1356_v28, %s2541_s7  ;;  %v2392_v43 = vpop.eup %2391 }
 0x6c4   :  { %v2394_v6 = vpop.eup %2393  ;;  %2185 = vmatpush3.bf16.msra.mxu1 %v2296_v63  ;;  %v2445_v63 = vld [vmem:[%s3411_s2] ss:$2 sm:$0xff] }
 0x6c5   :  { %1377 = vrot.lane.b32.xlu0 %v1357_v58, %s2541_s7  ;;  %v2396_v42 = vpop.eup %2395 }
 0x6c7   :  { %1379 = vrot.lane.b32.xlu1 %v1358_v36, %s2541_s7 }
 0x6c9   :  { %1333 = vrot.lane.b32.xlu0 %v2390_v4, %s2541_s7 }
 0x6cb   :  { %1335 = vrot.lane.b32.xlu1 %v2392_v43, %s2541_s7 }
 0x6cd   :  { %1329 = vrot.lane.b32.xlu0 %v2394_v6, %s2541_s7 }
 0x6cf   :  { %1331 = vrot.lane.b32.xlu1 %v2396_v42, %s2541_s7  ;;  %v2298_v42 = vld [vmem:[#allocation7 + $0x48] sm:$0xff]  }
 0x6d1   :  { %1381 = vrot.lane.b32.xlu0 %v1359_v3, %s2541_s7  ;;  %v2300_v3 = vld [vmem:[#allocation7 + $0x58] sm:$0xff]  }
 0x6d3   :  { %1383 = vrot.lane.b32.xlu1 %v1360_v27, %s2541_s7  ;;  %v92_v27 = vsub.s32 2, %v2755_v7 }
 0x72b   :  { %v1326_v59 = vpop.permute.xlu0 %1325 }
 0x72c   :  { %v1347_v44 = vmul.f32 %v1326_v59, %v951_v51 }
 0x72d   :  { %v1328_v2 = vpop.permute.xlu1 %1327 }
 0x72e   :  { %v1348_v55 = vmul.f32 %v1328_v2, %v952_v26  ;;  %v3438_v2 = vld [vmem:[#allocation12_spill] sm:$0xff] }
 0x72f   :  { %v1322_v45 = vpop.permute.xlu0 %1321 }
 0x730   :  { %v1345_v25 = vmul.f32 %v1322_v45, %v949_v19 }
 0x731   :  { %v1324_v37 = vpop.permute.xlu1 %1323 }
 0x732   :  { %v1346_v11 = vmul.f32 %v1324_v37, %v950_v32  ;;  %v3215_v22 = vadd.f32 %v1370_v23, %v1345_v25  ;;  %v93_v23 = vrot.slane %v2445_v63, %v92_v27  ;;  %v3439_v37 = vld [vmem:[#allocation15_spill] sm:$0xff] }
 0x733   :  { %v1374_v1 = vpop.permute.xlu0 %1373 }
 0x734   :  { %v3217_v35 = vadd.f32 %v1372_v30, %v1346_v11  ;;  %v3219_v15 = vadd.f32 %v1374_v1, %v1347_v44  ;;  %v3437_v30 = vld [vmem:[#allocation14_spill] sm:$0xff]  ;;  %v281_v45 = vadd.f32 %v3438_v2, %v93_v23  ;;  %v295_v11 = vadd.f32 %v3439_v37, %v93_v23 }
 0x735   :  { %v1376_v9 = vpop.permute.xlu1 %1375  ;;  %v291_v59 = vadd.f32 %v3437_v30, %v93_v23 }
 0x736   :  { %v3221_v38 = vadd.f32 %v1376_v9, %v1348_v55  ;;  %v1401_v41 = vpack.c.bf16 %v3217_v35, %v3215_v22  ;;  %v3440_v55 = vld [vmem:[#allocation13_spill] sm:$0xff] }
 0x737   :  { %v1378_v19 = vpop.permute.xlu0 %1377  ;;  %v285_v9 = vadd.f32 %v3440_v55, %v93_v23 }
 0x738   :  { %1418 = vrot.lane.b32.xlu0 %v1401_v41, %s2541_s7  ;;  %v1402_v56 = vpack.c.bf16 %v3221_v38, %v3219_v15 }
 0x739   :  { %v1380_v32 = vpop.permute.xlu1 %1379 }
 0x73a   :  { %1420 = vrot.lane.b32.xlu1 %v1402_v56, %s2541_s7 }
 0x73b   :  { %v1334_v57 = vpop.permute.xlu0 %1333 }
 0x73c   :  { %v1351_v36 = vmul.f32 %v1334_v57, %v955_v20 }
 0x73d   :  { %v1336_v51 = vpop.permute.xlu1 %1335 }
 0x73e   :  { %v1352_v4 = vmul.f32 %v1336_v51, %v956_v24  ;;  %v2297_v24 = vld [vmem:[#allocation7 + $0x40] sm:$0xff]  }
 0x73f   :  { %v1330_v26 = vpop.permute.xlu0 %1329  ;;  %2194 = vmatprep.subr.bf16.mxu0 %v2297_v24 }
 0x740   :  { %v1349_v40 = vmul.f32 %v1330_v26, %v953_v48  ;;  %2195 = vmatpush3.bf16.msra.mxu0 %v2297_v24 }
 0x741   :  { %v1332_v46 = vpop.permute.xlu1 %1331  ;;  %2196 = vmatprep.subr.bf16.mxu0 %v2298_v42 }
 0x742   :  { %v1350_v28 = vmul.f32 %v1332_v46, %v954_v33  ;;  %v3237_v43 = vadd.f32 %v1378_v19, %v1349_v40  ;;  %v3441_v46 = vld [vmem:[#allocation18_spill] sm:$0xff] }
 0x743   :  { %v1382_v58 = vpop.permute.xlu0 %1381 }
 0x744   :  { %v3239_v5 = vadd.f32 %v1380_v32, %v1350_v28  ;;  %v3241_v6 = vadd.f32 %v1382_v58, %v1351_v36  ;;  %2197 = vmatpush3.bf16.msra.mxu0 %v2298_v42  ;;  %v311_v28 = vadd.f32 %v3441_v46, %v93_v23  ;;  %v3442_v36 = vld [vmem:[#allocation16_spill] sm:$0xff] }
 0x745   :  { %v1384_v16 = vpop.permute.xlu1 %1383  ;;  %2198 = vmatprep.subr.bf16.mxu0 %v2299_v18 }
 0x746   :  { %v3243_v34 = vadd.f32 %v1384_v16, %v1352_v4  ;;  %v1403_v29 = vpack.c.bf16 %v3239_v5, %v3237_v43  ;;  %v301_v4 = vadd.f32 %v3442_v36, %v93_v23 }
 0x748   :  { %1422 = vrot.lane.b32.xlu0 %v1403_v29, %s2541_s7  ;;  %v1404_v48 = vpack.c.bf16 %v3243_v34, %v3241_v6  ;;  %2199 = vmatpush3.bf16.msra.mxu0 %v2299_v18  ;;  %v3444_v18 = vld [vmem:[#allocation17_spill] sm:$0xff] }
 0x749   :  { %2200 = vmatprep.subr.bf16.mxu0 %v2300_v3 }
 0x74a   :  { %1424 = vrot.lane.b32.xlu1 %v1404_v48, %s2541_s7 }
 0x74c   :  { %2201 = vmatpush3.bf16.msra.mxu0 %v2300_v3  ;;  %v305_v3 = vadd.f32 %v3444_v18, %v93_v23 }
 0x7aa   :  { %v1419_v8 = vpop.permute.xlu0 %1418 }
 0x7ab   :  { %2186 = vmatprep.mubr.msk.bf16.mxu1 %vm517_vm3, %v1419_v8  ;;  %v3443_v8 = vld [vmem:[#allocation19_spill] sm:$0xff] }
 0x7ac   :  { %v1421_v33 = vpop.permute.xlu1 %1420 }
 0x7ad   :  { %2187 = vmatmul.mubr.msk.bf16.vlgmr.msra.gmra.mrb[48].mxu1 %vm517_vm3, %v1421_v33  ;;  %v315_v33 = vadd.f32 %v3443_v8, %v93_v23 }
 0x7ba   :  { %v1423_v62 = vpop.permute.xlu0 %1422 }
 0x7bb   :  { %2190 = vmatprep.mubr.msk.bf16.mxu1 %vm517_vm3, %v1423_v62 }
 0x7bc   :  { %v1425_v20 = vpop.permute.xlu1 %1424 }
 0x7bd   :  { %2191 = vmatmul.mubr.msk.bf16.gmra.mrb[52].mxu1 %vm517_vm3, %v1425_v20 }
 0x880   :  { %v2188_v25 = vpop.f32.mrb[48].mxu1 }
 0x881   :  { %v1529_v1 = vadd.f32 %v2188_v25, %v291_v59  ;;  %v1496_v44 = vpop.f32.mrb[49].mxu1 }
 0x882   :  { %v1527_v41 = vadd.f32 %v1496_v44, %v281_v45  ;;  %v2189_v19 = vpop.f32.mrb[50].mxu1 }
 0x883   :  { %2397 = vtanh.f32 %v1529_v1  ;;  %v1530_v56 = vadd.f32 %v2189_v19, %v295_v11  ;;  %v1499_v32 = vpop.f32.mrb[51].mxu1 }
 0x884   :  { %2399 = vtanh.f32 %v1527_v41  ;;  %v1528_v57 = vadd.f32 %v1499_v32, %v285_v9 }
 0x885   :  { %2401 = vtanh.f32 %v1530_v56 }
 0x886   :  { %2403 = vtanh.f32 %v1528_v57 }
 0x88d   :  { %v3263_v51 = vpop.eup %2397 }
 0x88e   :  { %v3265_v26 = vpop.eup %2399  ;;  %v1545_v29 = vmul.f32 %v3263_v51, %v3219_v15 }
 0x88f   :  { %v3267_v40 = vpop.eup %2401  ;;  %v1543_v24 = vmul.f32 %v3265_v26, %v3215_v22 }
 0x890   :  { %v3270_v58 = vpop.eup %2403  ;;  %v2192_v16 = vpop.f32.mrb[52].mxu1  ;;  %v1546_v48 = vmul.f32 %v3267_v40, %v3221_v38 }
 0x891   :  { %v1533_v62 = vadd.f32 %v2192_v16, %v311_v28  ;;  %v1512_v20 = vpop.f32.mrb[53].mxu1  ;;  %v1544_v42 = vmul.f32 %v3270_v58, %v3217_v35 }
 0x892   :  { %v1531_v27 = vadd.f32 %v1512_v20, %v301_v4  ;;  %v2193_v63 = vpop.f32.mrb[54].mxu1  ;;  %v1552_v30 = vpack.c.bf16 %v1546_v48, %v1545_v29 }
 0x893   :  { %2405 = vtanh.f32 %v1533_v62  ;;  %v1534_v59 = vadd.f32 %v2193_v63, %v315_v33  ;;  %v1515_v2 = vpop.f32.mrb[55].mxu1  ;;  %v1551_v45 = vpack.c.bf16 %v1544_v42, %v1543_v24 }
 0x894   :  { %2407 = vtanh.f32 %v1531_v27  ;;  %v1532_v25 = vadd.f32 %v1515_v2, %v305_v3  ;;  %1570 = vrot.lane.b32.xlu1 %v1552_v30, %s2541_s7 }
 0x895   :  { %2409 = vtanh.f32 %v1534_v59  ;;  %1568 = vrot.lane.b32.xlu0 %v1551_v45, %s2541_s7  ;;  %v2547_v59 = vmov 0.0|0.0  }
 0x896   :  { %2411 = vtanh.f32 %v1532_v25  ;;  %2229 = vmatprep.subr.bf16.mxu1 %v2547_v59 }
 0x89d   :  { %v3285_v37 = vpop.eup %2405 }
 0x89e   :  { %v3287_v11 = vpop.eup %2407  ;;  %v1549_v44 = vmul.f32 %v3285_v37, %v3241_v6 }
 0x89f   :  { %v3289_v23 = vpop.eup %2409  ;;  %v1547_v9 = vmul.f32 %v3287_v11, %v3237_v43 }
 0x8a0   :  { %v3291_v1 = vpop.eup %2411  ;;  %v1550_v55 = vmul.f32 %v3289_v23, %v3243_v34 }
 0x8a1   :  { %v1548_v41 = vmul.f32 %v3291_v1, %v3239_v5 }
 0x8a2   :  { %v1554_v19 = vpack.c.bf16 %v1550_v55, %v1549_v44 }
 0x8a3   :  { %v1553_v56 = vpack.c.bf16 %v1548_v41, %v1547_v9  ;;  %v606_v41 = vadd.f32 %v2867_v21, %v2967_v12  ;;  %v3449_v21 = vld [vmem:[#allocation27_spill] sm:$0xff] }
 0x8a4   :  { %1574 = vrot.lane.b32.xlu1 %v1554_v19, %s2541_s7  ;;  %v3446_v19 = vld [vmem:[#allocation24_spill] sm:$0xff]  ;;  %v614_v12 = vadd.f32 %v3449_v21, %v2983_v54 }
 0x8a5   :  { %1572 = vrot.lane.b32.xlu0 %v1553_v56, %s2541_s7  ;;  %v608_v56 = vadd.f32 %v3446_v19, %v2971_v17 }
 0x906   :  { %v1571_v57 = vpop.permute.xlu1 %1570 }
 0x907   :  { %v1569_v32 = vpop.permute.xlu0 %1568 }
 0x908   :  { %2202 = vmatprep.mubr.msk.bf16.mxu0 %vm517_vm3, %v1569_v32 }
 0x909   :  { %2203 = vmatmul.mubr.msk.bf16.vlgmr.msra.gmra.mrb[56].mxu0 %vm517_vm3, %v1571_v57 }
 0x916   :  { %v1575_v28 = vpop.permute.xlu1 %1574 }
 0x917   :  { %v1573_v46 = vpop.permute.xlu0 %1572 }
 0x918   :  { %2206 = vmatprep.mubr.msk.bf16.mxu0 %vm517_vm3, %v1573_v46 }
 0x919   :  { %2207 = vmatmul.mubr.msk.bf16.gmra.mrb[60].mxu0 %vm517_vm3, %v1575_v28  ;;  %v3448_v28 = vld [vmem:[#allocation26_spill] sm:$0xff] }
 0x9dc   :  { %v2204_v36 = vpop.f32.mrb[56].mxu0 }
 0x9dd   :  { %v1646_v4 = vpop.f32.mrb[57].mxu0 }
 0x9de   :  { %1685 = vrot.lane.b32.xlu0 %v1646_v4, %s2541_s7  ;;  %v2205_v16 = vpop.f32.mrb[58].mxu0 }
 0x9df   :  { %v1649_v29 = vpop.f32.mrb[59].mxu0 }
 0x9e0   :  { %1687 = vrot.lane.b32.xlu1 %v1649_v29, %s2541_s7 }
 0x9e2   :  { %1689 = vrot.lane.b32.xlu0 %v2204_v36, %s2541_s7  ;;  %v612_v36 = vadd.f32 %v3448_v28, %v2980_v13 }
 0x9e4   :  { %1691 = vrot.lane.b32.xlu1 %v2205_v16, %s2541_s7 }
 0x9ec   :  { %v2208_v48 = vpop.f32.mrb[60].mxu0 }
 0x9ed   :  { %v1662_v8 = vpop.f32.mrb[61].mxu0 }
 0x9ee   :  { %1693 = vrot.lane.b32.xlu0 %v1662_v8, %s2541_s7  ;;  %v2209_v33 = vpop.f32.mrb[62].mxu0 }
 0x9ef   :  { %v1665_v62 = vpop.f32.mrb[63].mxu0 }
 0x9f0   :  { %1695 = vrot.lane.b32.xlu1 %v1665_v62, %s2541_s7 }
 0x9f2   :  { %1697 = vrot.lane.b32.xlu0 %v2208_v48, %s2541_s7 }
 0x9f4   :  { %1699 = vrot.lane.b32.xlu1 %v2209_v33, %s2541_s7 }
 0x9f6   :  { %1781 = vrot.lane.b32.xlu0 %v3215_v22, %s2541_s7 }
 0x9f8   :  { %1783 = vrot.lane.b32.xlu1 %v3217_v35, %s2541_s7 }
 0xa50   :  { %v1686_v20 = vpop.permute.xlu0 %1685 }
 0xa51   :  { %v1709_v24 = vadd.f32 %v1686_v20, %v3153_v53 }
 0xa52   :  { %v1688_v42 = vpop.permute.xlu1 %1687 }
 0xa53   :  { %2413 = vtanh.f32 %v1709_v24  ;;  %v1710_v18 = vadd.f32 %v1688_v42, %v3160_v61 }
 0xa54   :  { %v1690_v3 = vpop.permute.xlu0 %1689 }
 0xa55   :  { %2415 = vtanh.f32 %v1710_v18  ;;  %v1711_v27 = vadd.f32 %v1690_v3, %v3150_v50  ;;  %v3452_v3 = vld [vmem:[#allocation28_spill] sm:$0xff] }
 0xa56   :  { %v1692_v63 = vpop.permute.xlu1 %1691 }
 0xa57   :  { %2417 = vtanh.f32 %v1711_v27  ;;  %v1712_v30 = vadd.f32 %v1692_v63, %v3156_v52  ;;  %v616_v27 = vadd.f32 %v3452_v3, %v2987_v0 }
 0xa59   :  { %2419 = vtanh.f32 %v1712_v30 }
 0xa5d   :  { %v2414_v22 = vpop.eup %2413 }
 0xa5e   :  { %1741 = vrot.lane.b32.xlu0 %v2414_v22, %s2541_s7 }
 0xa5f   :  { %v2416_v53 = vpop.eup %2415 }
 0xa60   :  { %v1694_v35 = vpop.permute.xlu0 %1693  ;;  %1743 = vrot.lane.b32.xlu1 %v2416_v53, %s2541_s7 }
 0xa61   :  { %v2418_v61 = vpop.eup %2417  ;;  %v1713_v2 = vadd.f32 %v1694_v35, %v3175_v60 }
 0xa62   :  { %1745 = vrot.lane.b32.xlu0 %v2418_v61, %s2541_s7  ;;  %v1696_v50 = vpop.permute.xlu1 %1695 }
 0xa63   :  { %v2420_v45 = vpop.eup %2419  ;;  %2421 = vtanh.f32 %v1713_v2  ;;  %v1714_v52 = vadd.f32 %v1696_v50, %v3180_v10 }
 0xa64   :  { %v1698_v25 = vpop.permute.xlu0 %1697  ;;  %1747 = vrot.lane.b32.xlu1 %v2420_v45, %s2541_s7 }
 0xa65   :  { %2423 = vtanh.f32 %v1714_v52  ;;  %v1715_v44 = vadd.f32 %v1698_v25, %v3166_v31 }
 0xa66   :  { %1785 = vrot.lane.b32.xlu0 %v3219_v15, %s2541_s7  ;;  %v1700_v55 = vpop.permute.xlu1 %1699 }
 0xa67   :  { %2425 = vtanh.f32 %v1715_v44  ;;  %v1716_v60 = vadd.f32 %v1700_v55, %v3170_v14  ;;  %v2549_v14 = vmov 0.0  }
 0xa68   :  { %1787 = vrot.lane.b32.xlu1 %v3221_v38, %s2541_s7  ;;  %2226 = vmatprep.mubr.msk.f32.mxu1 %vm2548_vm4, %v2549_v14  ;;  %v1782_v57 = vpop.permute.xlu0 %1781 }
 0xa69   :  { %2427 = vtanh.f32 %v1716_v60 }
 0xa6a   :  { %1789 = vrot.lane.b32.xlu0 %v3237_v43, %s2541_s7  ;;  %v1822_v43 = vld [vmem:[%s3411_s2 + $0x1] sm:$0x1] }
 0xa6c   :  { %1791 = vrot.lane.b32.xlu1 %v3239_v5, %s2541_s7  ;;  %v3445_v5 = vld [vmem:[#allocation23_spill] sm:$0xff] }
 0xa6d   :  { %v2422_v10 = vpop.eup %2421  ;;  %v604_v9 = vadd.f32 %v3445_v5, %v2964_v49  ;;  %v1784_v49 = vpop.permute.xlu1 %1783 }
 0xa6e   :  { %1749 = vrot.lane.b32.xlu0 %v2422_v10, %s2541_s7  ;;  %v1806_v8 = vmul.f32 %v3270_v58, %v1784_v49  ;;  %v3453_v58 = vld [vmem:[#allocation29_spill] sm:$0xff] }
 0xa6f   :  { %v2424_v31 = vpop.eup %2423  ;;  %2429 = vtanh.f32 %v604_v9  ;;  %v618_v63 = vadd.f32 %v3453_v58, %v2992_v47 }
 0xa70   :  { %1751 = vrot.lane.b32.xlu1 %v2424_v31, %s2541_s7  ;;  %2431 = vtanh.f32 %v606_v41 }
 0xa71   :  { %v2426_v15 = vpop.eup %2425  ;;  %2433 = vtanh.f32 %v608_v56 }
 0xa72   :  { %1753 = vrot.lane.b32.xlu0 %v2426_v15, %s2541_s7 }
 0xa73   :  { %v2428_v38 = vpop.eup %2427 }
 0xa74   :  { %1755 = vrot.lane.b32.xlu1 %v2428_v38, %s2541_s7 }
 0xa76   :  { %1793 = vrot.lane.b32.xlu0 %v3241_v6, %s2541_s7  ;;  %v3447_v6 = vld [vmem:[#allocation25_spill] sm:$0xff] }
 0xa77   :  { %v610_v32 = vadd.f32 %v3447_v6, %v2975_v39  ;;  %v1805_v39 = vmul.f32 %v3265_v26, %v1782_v57 }
 0xa78   :  { %1795 = vrot.lane.b32.xlu1 %v3243_v34, %s2541_s7 }
 0xa79   :  { %v2430_v34 = vpop.eup %2429  ;;  %2435 = vtanh.f32 %v610_v32 }
 0xa7a   :  { %1825 = vperm.xlu0 %2257, %v1822_v43   ;;  %v2432_v46 = vpop.eup %2431  ;;  %v1725_v4 = vsub.f32 1.0, %v2430_v34  ;;  %2437 = vtanh.f32 %v612_v36 }
 0xa7b   :  { %v1726_v48 = vsub.f32 1.0, %v2432_v46  ;;  %2439 = vtanh.f32 %v614_v12  ;;  %v2434_v20 = vpop.eup %2433 }
 0xa7c   :  { %v1727_v22 = vsub.f32 1.0, %v2434_v20  ;;  %2441 = vtanh.f32 %v616_v27 }
 0xa7d   :  { %2443 = vtanh.f32 %v618_v63 }
 0xa83   :  { %v2436_v42 = vpop.eup %2435 }
 0xa84   :  { %v1728_v53 = vsub.f32 1.0, %v2436_v42  ;;  %v2438_v45 = vpop.eup %2437 }
 0xa85   :  { %v2440_v44 = vpop.eup %2439 }
 0xa86   :  { %v1730_v15 = vsub.f32 1.0, %v2440_v44  ;;  %v2442_v9 = vpop.eup %2441 }
 0xa87   :  { %v2444_v56 = vpop.eup %2443  ;;  %v1731_v57 = vsub.f32 1.0, %v2442_v9 }
 0xa88   :  { %v1732_v46 = vsub.f32 1.0, %v2444_v56 }
 0xad0   :  { %v1742_v16 = vpop.permute.xlu0 %1741 }
 0xad1   :  { %v1765_v29 = vmul.f32 %v1742_v16, %v1725_v4  ;;  %v2550_v16 = vmov 269488144  }
 0xad2   :  { %v1744_v17 = vpop.permute.xlu1 %1743 }
 0xad3   :  { %v1766_v33 = vmul.f32 %v1744_v17, %v1726_v48  ;;  %v1813_v24 = vadd.f32 %v1805_v39, %v1765_v29  ;;  %v1829_v29 = vunpack.c.l.s4 %v2550_v16 }
 0xad4   :  { %v1746_v62 = vpop.permute.xlu0 %1745 }
 0xad5   :  { %v1814_v13 = vadd.f32 %v1806_v8, %v1766_v33  ;;  %v1767_v2 = vmul.f32 %v1746_v62, %v1727_v22  ;;  %v1830_v48 = vunpack.c.0.s8 %v1829_v29 }
 0xad6   :  { %v1748_v18 = vpop.permute.xlu1 %1747 }
 0xad7   :  { %v2230_v26 = vpack.c.bf16 %v1814_v13, %v1813_v24  ;;  %v1768_v50 = vmul.f32 %v1748_v18, %v1728_v53 }
 0xad8   :  { %v1786_v30 = vpop.permute.xlu0 %1785 }
 0xad9   :  { %v1807_v35 = vmul.f32 %v3263_v51, %v1786_v30  ;;  %2232 = vmatpush3.bf16.xpose.msk.msra.mxu1 %vm3367_vm5, %v2230_v26  ;;  %v1729_v51 = vsub.f32 1.0, %v2438_v45 }
 0xada   :  { %v1788_v61 = vpop.permute.xlu1 %1787  ;;  %2233 = vmatprep.subr.bf16.mxu1 %v2547_v59 }
 0xadb   :  { %v1808_v0 = vmul.f32 %v3267_v40, %v1788_v61  ;;  %v1815_v47 = vadd.f32 %v1807_v35, %v1767_v2 }
 0xadc   :  { %v1790_v52 = vpop.permute.xlu0 %1789 }
 0xadd   :  { %v1816_v25 = vadd.f32 %v1808_v0, %v1768_v50  ;;  %v1809_v40 = vmul.f32 %v3287_v11, %v1790_v52 }
 0xade   :  { %v1792_v55 = vpop.permute.xlu1 %1791 }
 0xadf   :  { %v2234_v60 = vpack.c.bf16 %v1816_v25, %v1815_v47  ;;  %v1810_v38 = vmul.f32 %v3291_v1, %v1792_v55 }
 0xae0   :  { %v1750_v10 = vpop.permute.xlu0 %1749 }
 0xae1   :  { %v1769_v31 = vmul.f32 %v1750_v10, %v1729_v51  ;;  %2236 = vmatpush3.bf16.xpose.msk.msra.mxu1 %vm3367_vm5, %v2234_v60 }
 0xae2   :  { %v1752_v14 = vpop.permute.xlu1 %1751  ;;  %2237 = vmatprep.subr.bf16.mxu1 %v2547_v59 }
 0xae3   :  { %v1770_v43 = vmul.f32 %v1752_v14, %v1730_v15  ;;  %v1817_v41 = vadd.f32 %v1809_v40, %v1769_v31 }
 0xae4   :  { %v1754_v5 = vpop.permute.xlu0 %1753 }
 0xae5   :  { %v1818_v19 = vadd.f32 %v1810_v38, %v1770_v43  ;;  %v1771_v11 = vmul.f32 %v1754_v5, %v1731_v57 }
 0xae6   :  { %v1756_v6 = vpop.permute.xlu1 %1755 }
 0xae7   :  { %v2238_v32 = vpack.c.bf16 %v1818_v19, %v1817_v41  ;;  %v1772_v1 = vmul.f32 %v1756_v6, %v1732_v46 }
 0xae8   :  { %v1794_v34 = vpop.permute.xlu0 %1793 }
 0xae9   :  { %v1811_v28 = vmul.f32 %v3285_v37, %v1794_v34  ;;  %2240 = vmatpush3.bf16.xpose.msk.msra.mxu1 %vm3367_vm5, %v2238_v32  ;;  %v1821_v37 = vld [vmem:[%s3411_s2 + $0xd] sm:$0x1]  ;;  %s2516_s2 = scalar_lea.vmem %s1941_s21, 32 }
 0xaea   :  { %v1796_v36 = vpop.permute.xlu1 %1795  ;;  %2241 = vmatprep.subr.bf16.mxu1 %v2547_v59  ;;  %v1833_v59 = vsub.s32 %v1830_v48, %v2755_v7  ;;  %p2518_p12 = scmp.lt.s32.totalorder %s2516_s2, %s2512_s3 }
 0xaeb   :  { %v1812_v49 = vmul.f32 %v3289_v23, %v1796_v36  ;;  %v1819_v4 = vadd.f32 %v1811_v28, %v1771_v11 }
 0xaec   :  { %p2519_p13 = por %p2518_p12, %p2517_p11 }
 0xaed   :  { %v1820_v21 = vadd.f32 %v1812_v49, %v1772_v1 }
 0xaee   :  { %p2520_p0 = pnand %p2519_p13, %p2513_p10 }
 0xaef   :  { %v2242_v12 = vpack.c.bf16 %v1820_v21, %v1819_v4 }
 0xaf1   :  { %2244 = vmatpush3.bf16.xpose.msk.msra.mxu1 %vm3367_vm5, %v2242_v12 }
 0xaf8   :  { %2227 = vmatmul.mubr.msk.f32.vlgmr.msra.gmra.mrb[56].mxu1 %vm517_vm3, %v1821_v37 }
 0xaf9   :  { %v1826_v17 = vpop.permute.xlu0 %1825 }
 0xafa   :  { %v1834_v39 = vrot.slane %v1826_v17, %v1833_v59 }
 0xbcb   :  { %v1928_v23 = vpop.f32.mrb[56].mxu1 }
 0xbcc   :  { %v1929_v8 = vadd.f32 %v1928_v23, %v1834_v39  ;;  %v2228_v33 = vpop.f32.mrb[57].mxu1 }
 0xbce   :  { %1933 = vst.msk [vmem:[#allocation8] sm:$0x1] %vm1932_vm6, %v1929_v8 }
 0xbcf   :  { %2523 = shalt.err (!%p2520_p0)
}
 0xbd0   :  { %s2524_s0 = scalar_lea.hbm %s3415_s6, 16 }
 0xbd1   :  { %p2525_p1 = scmp.ne.s32.totalorder %s3415_s6, %s2524_s0  ;;  %p2528_p2 = scmp.lt.u32.totalorder %s2524_s0, %s3415_s6 }
 0xbd3   :  { %p2530_p3 = pnand %p2528_p2, %p2525_p1 }
 0xbd5   :  { %2533 = shalt.err (!%p2530_p3)
}
 0xbd6   :  { %1943 = dma.vmem_to_hbm [thread:$0]  %s1941_s21, 16, %s3415_s6, [#allocation4]  }
 0xbd7   :  { %2538 = dma.done.wait [#allocation4], 16  }
 0xbd8   :  { %2539 = vsyncadd [#allocation4], 4294967280 }
 0xbd9   :  { %1947 = vsyncpa [#allocation3], 1 }
 0xbda   :  { %1948 = vsyncpa [#allocation6], 1 }
 0xbdb   :  { %1949 = vsyncpa [#allocation4], 1 }

</bundles_post_ra>
